<compile_context>
chip_gen: v5e
topology: v5e:2x2
jax: 0.10.0
libtpu: 0.0.40
codegen_flags: <defaults>
</compile_context>

<pallas_src>
import numpy as np
import jax
import jax.numpy as jnp
from jax import lax
from jax.experimental import pallas as pl
from jax.experimental.pallas import tpu as pltpu

num_samples = 8  # fixed by the PyTorch module's forward()

# Small-scale configs mirroring the structure of the PyTorch module
# (conv: 3x3, stride 1, pad 1, ReLU, 2x2 maxpool;
#  fc: Linear -> ReLU -> Dropout, Linear -> ReLU -> Dropout, Linear -> Softmax).
CONV_CONFIG = [
    {"in_ch": 4, "out_ch": 8, "activation": True, "maxpool": True},
    {"in_ch": 8, "out_ch": 16, "activation": True, "maxpool": True},
]
FC_CONFIG = [
    {"in_nodes": 16 * 4 * 4, "out_nodes": 64, "activation": "relu", "dropout": 0.5},
    {"in_nodes": 64, "out_nodes": 64, "activation": "relu", "dropout": 0.5},
    {"in_nodes": 64, "out_nodes": 10, "activation": "softmax"},
]

IMG_H = IMG_W = 16  # input spatial size; input is NCHW (8, 4, 16, 16)


# --------------------- parameter-side plumbing (trace-time) -----------------

def _banded_conv_weight(wt, width):
    """wt (3,3,Cin,Cout) HWIO -> (3, width*Cin, width*Cout) banded matrices.

    band[kh][win*Cin + c, wout*Cout + d] = wt[kh, win - wout + 1, c, d]
    (0 outside), so (vertically shifted slab) @ band[kh] performs the
    horizontal part of the 3x3 conv including the width-1 zero padding.
    """
    cin, cout = wt.shape[2], wt.shape[3]
    bands = []
    for kh in range(3):
        b = jnp.zeros((width * cin, width * cout), jnp.float32)
        for kw in range(3):
            shift = jnp.asarray(np.eye(width, k=1 - kw, dtype=np.float32))
            b = b + jnp.kron(shift, wt[kh, kw])
        bands.append(b)
    return jnp.stack(bands)


def _interleave_zero_rows(mat_4d):
    """[..., w, c, cols] -> [..., 2*w interleaved (data, zeros), c, cols].

    Folds a "keep only even-w columns" pool compaction into the weight that
    multiplies on the right of an un-compacted activation slab.
    """
    return jnp.stack([mat_4d, jnp.zeros_like(mat_4d)], axis=-3)


# ----------------------------- fused Pallas kernel --------------------------
#
# Row space stays un-compacted (128 = N*16 rows) through both convs/pools:
#   conv1/pool1 meaningful rows: i*16 + 2*h2   (h2 in [0,8))
#   conv2/pool2 meaningful rows: i*16 + 4*h3   (h3 in [0,4))
# Pool column compaction is folded into w2stack / wf1stack (zero rows at odd
# width positions), so garbage in "odd" rows/columns never reaches the output.

def _vgg_fused_kernel(x3_ref, w1_ref, w2_ref, wf1_ref, wf2_ref, wf3_ref,
                      b_ref, o_ref):
    bf16 = jnp.bfloat16

    def mm(a, b):
        return jnp.dot(a, b, preferred_element_type=jnp.float32)

    bias = b_ref[...]                                     # (8, 128) f32

    # ---- conv1: single K=192 matmul (shifts pre-folded into x3, horizontal
    #      padding folded into the banded weight), bias + ReLU in f32 --------
    a1 = mm(x3_ref[...], w1_ref[...]) + bias[0:1, :]       # (128, 128)
    a1 = jnp.maximum(a1, 0.0)

    # ---- maxpool1 2x2/2: partner-max via rolls (XLU); compaction deferred --
    a1 = jnp.maximum(a1, pltpu.roll(a1, 127, 0))           # rows h, h+1
    a1 = jnp.maximum(a1, pltpu.roll(a1, 120, 1))           # width w, w+1 (C1=8)

    # ---- conv2: vertical +/-1 pooled-row shift == +/-2 un-compacted rows ---
    ridx = lax.rem(lax.broadcasted_iota(jnp.int32, (128, 128), 0), 16)
    up = jnp.where(ridx >= 2, pltpu.roll(a1, 2, 0), 0.0)     # pooled row h-1
    down = jnp.where(ridx < 14, pltpu.roll(a1, 126, 0), 0.0)  # pooled row h+1
    c2in = jnp.concatenate([up, a1, down], axis=1).astype(bf16)   # (128, 384)
    a2 = mm(c2in, w2_ref[...]) + bias[1:2, :]              # (128, 128)
    a2 = jnp.maximum(a2, 0.0)

    # ---- maxpool2: partners are +2 rows / +16 lanes in this layout ---------
    a2 = jnp.maximum(a2, pltpu.roll(a2, 126, 0))
    a2 = jnp.maximum(a2, pltpu.roll(a2, 112, 1))

    # ---- fc1: regroup the 4 pooled rows per sample via rolls, gather the 8
    #      sample rows with an in-kernel 0/1 selector, single K=512 matmul ---
    big = jnp.concatenate(
        [a2, pltpu.roll(a2, 124, 0), pltpu.roll(a2, 120, 0),
         pltpu.roll(a2, 116, 0)], axis=1).astype(bf16)     # (128, 512)
    col = lax.broadcasted_iota(jnp.int32, (8, 128), 1)
    row = lax.broadcasted_iota(jnp.int32, (8, 128), 0)
    g = jnp.where(col == row * 16, 1.0, 0.0).astype(bf16)  # (8, 128) selector
    flat = mm(g, big).astype(bf16)                         # (8, 512), exact
    y = jnp.maximum(mm(flat, wf1_ref[...]) + bias[2:3, 0:64], 0.0)   # (8, 64)
    # TODO(synk): nn.Dropout is treated as inference-mode identity (no RNG drop).

    # ---- fc2 + ReLU ---------------------------------------------------------
    y = jnp.maximum(mm(y.astype(bf16), wf2_ref[...]) + bias[3:4, 0:64], 0.0)

    # ---- fc3 + softmax over classes (dim=1), numerically stable, f32 -------
    logits = mm(y.astype(bf16), wf3_ref[...]) + bias[4:5, 0:10]      # (8, 10)
    m = jnp.max(logits, axis=-1, keepdims=True)
    e = jnp.exp(logits - m)
    o_ref[...] = (e / jnp.sum(e, axis=-1, keepdims=True)).astype(o_ref.dtype)


# ----------------------------- wrapper / model ------------------------------

def _build_operands(x_nchw, params):
    assert len(CONV_CONFIG) == 2 and len(FC_CONFIG) == 3
    assert all(c["activation"] and c["maxpool"] for c in CONV_CONFIG)

    n = num_samples
    h1 = w1 = IMG_H                                         # 16
    c0, c1 = CONV_CONFIG[0]["in_ch"], CONV_CONFIG[0]["out_ch"]   # 4, 8
    c2 = CONV_CONFIG[1]["out_ch"]                           # 16
    w2 = w1 // 2                                            # 8
    h3 = w3 = w2 // 2                                       # 4
    nf1 = FC_CONFIG[0]["out_nodes"]                         # 64
    assert FC_CONFIG[0]["in_nodes"] == c2 * h3 * w3
    bf16 = jnp.bfloat16

    # conv1 input: NCHW -> NHWC, pre-build the 3 vertical shifts (zero pad)
    # and lane-concatenate to one (N*H1, 3*W1*C0) = (128, 192) bf16 slab.
    x = jnp.transpose(x_nchw, (0, 2, 3, 1))                 # (8, 16, 16, 4)
    xp = jnp.pad(x, ((0, 0), (1, 1), (0, 0), (0, 0)))
    x3 = jnp.concatenate(
        [xp[:, kh:kh + h1].reshape(n * h1, w1 * c0) for kh in range(3)],
        axis=1).astype(bf16)                                # (128, 192)

    # conv1 banded weight stacked over kh -> (192, 128).
    w1b = _banded_conv_weight(params["conv0_w"], w1)        # (3, 64, 128)
    w1stack = w1b.reshape(3 * w1 * c0, w1 * c1).astype(bf16)

    # conv2 banded weight: fold the pool1 column compaction (even-w lanes only)
    # into the row space, stack over kh -> (384, 128).
    w2b = _banded_conv_weight(params["conv1_w"], w2)        # (3, 64, 128)
    w2b = w2b.reshape(3, w2, c1, w2 * c2)                   # [kh, w_in, c, :]
    w2stack = _interleave_zero_rows(w2b).reshape(
        3 * 2 * w2 * c1, w2 * c2).astype(bf16)              # (384, 128)

    # fc1 weight: fold in (a) torch NCHW flatten order, (b) pool2 column
    # compaction, (c) stacking over the 4 pooled rows -> (512, 64).
    wf1 = params["fc0_w"].reshape(c2, h3, w3, nf1)          # [c, h, w, :]
    wf1 = jnp.transpose(wf1, (1, 2, 0, 3))                  # [h, w, c, :]
    wf1stack = _interleave_zero_rows(wf1).reshape(
        h3 * 2 * w3 * c2, nf1).astype(bf16)                 # (512, 64)

    # All biases packed into one f32 (8, 128) operand (single DMA).
    biases = jnp.zeros((8, 128), jnp.float32)
    biases = biases.at[0, :].set(jnp.tile(params["conv0_b"], w1))
    biases = biases.at[1, :].set(jnp.tile(params["conv1_b"], w2))
    biases = biases.at[2, :nf1].set(params["fc0_b"])
    biases = biases.at[3, :FC_CONFIG[1]["out_nodes"]].set(params["fc1_b"])
    biases = biases.at[4, :FC_CONFIG[2]["out_nodes"]].set(params["fc2_b"])

    return (x3, w1stack, w2stack, wf1stack,
            params["fc1_w"].astype(bf16), params["fc2_w"].astype(bf16), biases)


def vggnet_forward(x_nchw, params):
    ops = _build_operands(x_nchw, params)
    # Single fused gridless kernel: whole arrays VMEM-resident, one launch.
    return pl.pallas_call(
        _vgg_fused_kernel,
        out_shape=jax.ShapeDtypeStruct(
            (num_samples, FC_CONFIG[-1]["out_nodes"]), jnp.float32),
    )(*ops)


def init_params(key):
    params = {}
    ks = jax.random.split(key, 2 * (len(CONV_CONFIG) + len(FC_CONFIG)))
    idx = 0
    for i, cfg in enumerate(CONV_CONFIG):
        cin, cout = cfg["in_ch"], cfg["out_ch"]
        bound = 1.0 / float((cin * 9) ** 0.5)
        params[f"conv{i}_w"] = jax.random.uniform(
            ks[idx], (3, 3, cin, cout), jnp.float32, -bound, bound); idx += 1
        params[f"conv{i}_b"] = jax.random.uniform(
            ks[idx], (cout,), jnp.float32, -bound, bound); idx += 1
    for i, cfg in enumerate(FC_CONFIG):
        fin, fout = cfg["in_nodes"], cfg["out_nodes"]
        bound = 1.0 / float(fin ** 0.5)
        params[f"fc{i}_w"] = jax.random.uniform(
            ks[idx], (fin, fout), jnp.float32, -bound, bound); idx += 1
        params[f"fc{i}_b"] = jax.random.uniform(
            ks[idx], (fout,), jnp.float32, -bound, bound); idx += 1
    return params


def reference_forward(x_nchw, params):
    """Plain-JAX (XLA, f32) reference with identical forward semantics."""
    x = jnp.transpose(x_nchw, (0, 2, 3, 1))
    for i in range(len(CONV_CONFIG)):
        w = params[f"conv{i}_w"]
        b = params[f"conv{i}_b"]
        n, h, wd, cin = x.shape
        xp = jnp.pad(x, ((0, 0), (1, 1), (1, 1), (0, 0)))
        cols = [xp[:, kh:kh + h, kw:kw + wd, :] for kh in range(3) for kw in range(3)]
        patches = jnp.concatenate(cols, axis=-1).reshape(n * h * wd, 9 * cin)
        y = jnp.maximum(patches @ w.reshape(9 * cin, -1) + b, 0.0).reshape(n, h, wd, -1)
        x = y.reshape(n, h // 2, 2, wd // 2, 2, y.shape[-1]).max(axis=(2, 4))
    x = jnp.transpose(x, (0, 3, 1, 2)).reshape(num_samples, -1)
    for i, cfg in enumerate(FC_CONFIG):
        x = x @ params[f"fc{i}_w"] + params[f"fc{i}_b"]
        if cfg["activation"] == "relu":
            x = jnp.maximum(x, 0.0)
        else:
            x = jax.nn.softmax(x, axis=-1)
    return x


if __name__ == "__main__":
    key = jax.random.PRNGKey(0)
    k_x, k_p = jax.random.split(key)
    x = jax.random.normal(
        k_x, (num_samples, CONV_CONFIG[0]["in_ch"], IMG_H, IMG_W), jnp.float32)
    params = init_params(k_p)

    out = jax.block_until_ready(jax.jit(vggnet_forward)(x, params))

    assert out.shape == (num_samples, FC_CONFIG[-1]["out_nodes"])
    assert bool(jnp.all(jnp.isfinite(out)))
    # softmax rows should sum to 1
    assert bool(jnp.allclose(jnp.sum(out, axis=-1), 1.0, atol=1e-5))

    # cross-check the fused bf16-operand kernel against the f32 reference
    ref = jax.block_until_ready(jax.jit(reference_forward)(x, params))
    err = float(jnp.max(jnp.abs(out - ref)))
    assert err < 2e-2, "max abs diff vs f32 reference: %f" % err

    print("KERNEL_OK")
</pallas_src>

<mosaic_0001>
module attributes {stable_mosaic.version = 11 : i64} {
  func.func @_vgg_fused_kernel(%arg0: memref<128x192xbf16, #tpu.memory_space<vmem>>, %arg1: memref<192x128xbf16, #tpu.memory_space<vmem>>, %arg2: memref<384x128xbf16, #tpu.memory_space<vmem>>, %arg3: memref<512x64xbf16, #tpu.memory_space<vmem>>, %arg4: memref<64x64xbf16, #tpu.memory_space<vmem>>, %arg5: memref<64x10xbf16, #tpu.memory_space<vmem>>, %arg6: memref<8x128xf32, #tpu.memory_space<vmem>>, %arg7: memref<8x10xf32, #tpu.memory_space<vmem>>) attributes {dimension_semantics = [], scalar_prefetch = 0 : i64, scratch_operands = 0 : i64, tpu.core_type = #tpu.core_type<tc>} {
    %c0 = arith.constant 0 : index
    %c0_0 = arith.constant 0 : index
    %0 = vector.load %arg6[%c0, %c0_0] : memref<8x128xf32, #tpu.memory_space<vmem>>, vector<8x128xf32>
    %c0_1 = arith.constant 0 : index
    %c0_2 = arith.constant 0 : index
    %1 = vector.load %arg0[%c0_1, %c0_2] : memref<128x192xbf16, #tpu.memory_space<vmem>>, vector<128x192xbf16>
    %c0_3 = arith.constant 0 : index
    %c0_4 = arith.constant 0 : index
    %2 = vector.load %arg1[%c0_3, %c0_4] : memref<192x128xbf16, #tpu.memory_space<vmem>>, vector<192x128xbf16>
    %cst = arith.constant dense<0.000000e+00> : vector<128x128xf32>
    %3 = tpu.matmul %1, %2, %cst {dimension_numbers = #tpu.dot_dimension_numbers<[1], [0], [0], [1], [0, 0, 1, 1], [], []>} : vector<128x192xbf16>, vector<192x128xbf16>, vector<128x128xf32> -> vector<128x128xf32>
    %4 = vector.extract_strided_slice %0 {offsets = [0, 0], sizes = [1, 128], strides = [1, 1]} : vector<8x128xf32> to vector<1x128xf32>
    %5 = vector.broadcast %4 : vector<1x128xf32> to vector<128x128xf32>
    %6 = arith.addf %3, %5 : vector<128x128xf32>
    %cst_5 = arith.constant 0.000000e+00 : f32
    %7 = vector.broadcast %cst_5 : f32 to vector<128x128xf32>
    %8 = arith.maximumf %6, %7 : vector<128x128xf32>
    %c127_i32 = arith.constant 127 : i32
    %9 = tpu.dynamic_rotate %8 by %c127_i32 dim 0 : vector<128x128xf32>, i32 -> vector<128x128xf32>
    %10 = arith.maximumf %8, %9 : vector<128x128xf32>
    %c120_i32 = arith.constant 120 : i32
    %11 = tpu.dynamic_rotate %10 by %c120_i32 dim 1 : vector<128x128xf32>, i32 -> vector<128x128xf32>
    %12 = arith.maximumf %10, %11 : vector<128x128xf32>
    %13 = tpu.iota {dimensions = array<i32: 0>} : vector<128x128xi32>
    %c16_i32 = arith.constant 16 : i32
    %14 = vector.broadcast %c16_i32 : i32 to vector<128x128xi32>
    %15 = arith.remsi %13, %14 : vector<128x128xi32>
    %c2_i32 = arith.constant 2 : i32
    %16 = vector.broadcast %c2_i32 : i32 to vector<128x128xi32>
    %17 = arith.cmpi sge, %15, %16 : vector<128x128xi32>
    %c2_i32_6 = arith.constant 2 : i32
    %18 = tpu.dynamic_rotate %12 by %c2_i32_6 dim 0 : vector<128x128xf32>, i32 -> vector<128x128xf32>
    %cst_7 = arith.constant 0.000000e+00 : f32
    %19 = vector.broadcast %cst_7 : f32 to vector<128x128xf32>
    %20 = arith.select %17, %18, %19 : vector<128x128xi1>, vector<128x128xf32>
    %c14_i32 = arith.constant 14 : i32
    %21 = vector.broadcast %c14_i32 : i32 to vector<128x128xi32>
    %22 = arith.cmpi slt, %15, %21 : vector<128x128xi32>
    %c126_i32 = arith.constant 126 : i32
    %23 = tpu.dynamic_rotate %12 by %c126_i32 dim 0 : vector<128x128xf32>, i32 -> vector<128x128xf32>
    %cst_8 = arith.constant 0.000000e+00 : f32
    %24 = vector.broadcast %cst_8 : f32 to vector<128x128xf32>
    %25 = arith.select %22, %23, %24 : vector<128x128xi1>, vector<128x128xf32>
    %26 = tpu.concatenate %20, %12, %25 in 1 : vector<128x128xf32>, vector<128x128xf32>, vector<128x128xf32> -> vector<128x384xf32>
    %27 = arith.truncf %26 : vector<128x384xf32> to vector<128x384xbf16>
    %c0_9 = arith.constant 0 : index
    %c0_10 = arith.constant 0 : index
    %28 = vector.load %arg2[%c0_9, %c0_10] : memref<384x128xbf16, #tpu.memory_space<vmem>>, vector<384x128xbf16>
    %cst_11 = arith.constant dense<0.000000e+00> : vector<128x128xf32>
    %29 = tpu.matmul %27, %28, %cst_11 {dimension_numbers = #tpu.dot_dimension_numbers<[1], [0], [0], [1], [0, 0, 1, 1], [], []>} : vector<128x384xbf16>, vector<384x128xbf16>, vector<128x128xf32> -> vector<128x128xf32>
    %30 = vector.extract_strided_slice %0 {offsets = [1, 0], sizes = [1, 128], strides = [1, 1]} : vector<8x128xf32> to vector<1x128xf32>
    %31 = vector.broadcast %30 : vector<1x128xf32> to vector<128x128xf32>
    %32 = arith.addf %29, %31 : vector<128x128xf32>
    %cst_12 = arith.constant 0.000000e+00 : f32
    %33 = vector.broadcast %cst_12 : f32 to vector<128x128xf32>
    %34 = arith.maximumf %32, %33 : vector<128x128xf32>
    %c126_i32_13 = arith.constant 126 : i32
    %35 = tpu.dynamic_rotate %34 by %c126_i32_13 dim 0 : vector<128x128xf32>, i32 -> vector<128x128xf32>
    %36 = arith.maximumf %34, %35 : vector<128x128xf32>
    %c112_i32 = arith.constant 112 : i32
    %37 = tpu.dynamic_rotate %36 by %c112_i32 dim 1 : vector<128x128xf32>, i32 -> vector<128x128xf32>
    %38 = arith.maximumf %36, %37 : vector<128x128xf32>
    %c124_i32 = arith.constant 124 : i32
    %39 = tpu.dynamic_rotate %38 by %c124_i32 dim 0 : vector<128x128xf32>, i32 -> vector<128x128xf32>
    %c120_i32_14 = arith.constant 120 : i32
    %40 = tpu.dynamic_rotate %38 by %c120_i32_14 dim 0 : vector<128x128xf32>, i32 -> vector<128x128xf32>
    %c116_i32 = arith.constant 116 : i32
    %41 = tpu.dynamic_rotate %38 by %c116_i32 dim 0 : vector<128x128xf32>, i32 -> vector<128x128xf32>
    %42 = tpu.concatenate %38, %39, %40, %41 in 1 : vector<128x128xf32>, vector<128x128xf32>, vector<128x128xf32>, vector<128x128xf32> -> vector<128x512xf32>
    %43 = arith.truncf %42 : vector<128x512xf32> to vector<128x512xbf16>
    %44 = tpu.iota {dimensions = array<i32: 1>} : vector<8x128xi32>
    %45 = tpu.iota {dimensions = array<i32: 0>} : vector<8x128xi32>
    %c16_i32_15 = arith.constant 16 : i32
    %46 = vector.broadcast %c16_i32_15 : i32 to vector<8x128xi32>
    %47 = arith.muli %45, %46 : vector<8x128xi32>
    %48 = arith.cmpi eq, %44, %47 : vector<8x128xi32>
    %cst_16 = arith.constant 1.000000e+00 : f32
    %cst_17 = arith.constant 0.000000e+00 : f32
    %49 = vector.broadcast %cst_16 : f32 to vector<8x128xf32>
    %50 = vector.broadcast %cst_17 : f32 to vector<8x128xf32>
    %51 = arith.select %48, %49, %50 : vector<8x128xi1>, vector<8x128xf32>
    %52 = arith.truncf %51 : vector<8x128xf32> to vector<8x128xbf16>
    %cst_18 = arith.constant dense<0.000000e+00> : vector<8x512xf32>
    %53 = tpu.matmul %52, %43, %cst_18 {dimension_numbers = #tpu.dot_dimension_numbers<[1], [0], [0], [1], [0, 0, 1, 1], [], []>} : vector<8x128xbf16>, vector<128x512xbf16>, vector<8x512xf32> -> vector<8x512xf32>
    %54 = arith.truncf %53 : vector<8x512xf32> to vector<8x512xbf16>
    %c0_19 = arith.constant 0 : index
    %c0_20 = arith.constant 0 : index
    %55 = vector.load %arg3[%c0_19, %c0_20] : memref<512x64xbf16, #tpu.memory_space<vmem>>, vector<512x64xbf16>
    %cst_21 = arith.constant dense<0.000000e+00> : vector<8x64xf32>
    %56 = tpu.matmul %54, %55, %cst_21 {dimension_numbers = #tpu.dot_dimension_numbers<[1], [0], [0], [1], [0, 0, 1, 1], [], []>} : vector<8x512xbf16>, vector<512x64xbf16>, vector<8x64xf32> -> vector<8x64xf32>
    %57 = vector.extract_strided_slice %0 {offsets = [2, 0], sizes = [1, 64], strides = [1, 1]} : vector<8x128xf32> to vector<1x64xf32>
    %58 = vector.broadcast %57 : vector<1x64xf32> to vector<8x64xf32>
    %59 = arith.addf %56, %58 : vector<8x64xf32>
    %cst_22 = arith.constant 0.000000e+00 : f32
    %60 = vector.broadcast %cst_22 : f32 to vector<8x64xf32>
    %61 = arith.maximumf %59, %60 : vector<8x64xf32>
    %62 = arith.truncf %61 : vector<8x64xf32> to vector<8x64xbf16>
    %c0_23 = arith.constant 0 : index
    %c0_24 = arith.constant 0 : index
    %63 = vector.load %arg4[%c0_23, %c0_24] : memref<64x64xbf16, #tpu.memory_space<vmem>>, vector<64x64xbf16>
    %cst_25 = arith.constant dense<0.000000e+00> : vector<8x64xf32>
    %64 = tpu.matmul %62, %63, %cst_25 {dimension_numbers = #tpu.dot_dimension_numbers<[1], [0], [0], [1], [0, 0, 1, 1], [], []>} : vector<8x64xbf16>, vector<64x64xbf16>, vector<8x64xf32> -> vector<8x64xf32>
    %65 = vector.extract_strided_slice %0 {offsets = [3, 0], sizes = [1, 64], strides = [1, 1]} : vector<8x128xf32> to vector<1x64xf32>
    %66 = vector.broadcast %65 : vector<1x64xf32> to vector<8x64xf32>
    %67 = arith.addf %64, %66 : vector<8x64xf32>
    %cst_26 = arith.constant 0.000000e+00 : f32
    %68 = vector.broadcast %cst_26 : f32 to vector<8x64xf32>
    %69 = arith.maximumf %67, %68 : vector<8x64xf32>
    %70 = arith.truncf %69 : vector<8x64xf32> to vector<8x64xbf16>
    %c0_27 = arith.constant 0 : index
    %c0_28 = arith.constant 0 : index
    %71 = vector.load %arg5[%c0_27, %c0_28] : memref<64x10xbf16, #tpu.memory_space<vmem>>, vector<64x10xbf16>
    %cst_29 = arith.constant dense<0.000000e+00> : vector<8x10xf32>
    %72 = tpu.matmul %70, %71, %cst_29 {dimension_numbers = #tpu.dot_dimension_numbers<[1], [0], [0], [1], [0, 0, 1, 1], [], []>} : vector<8x64xbf16>, vector<64x10xbf16>, vector<8x10xf32> -> vector<8x10xf32>
    %73 = vector.extract_strided_slice %0 {offsets = [4, 0], sizes = [1, 10], strides = [1, 1]} : vector<8x128xf32> to vector<1x10xf32>
    %74 = vector.broadcast %73 : vector<1x10xf32> to vector<8x10xf32>
    %75 = arith.addf %72, %74 : vector<8x10xf32>
    %cst_30 = arith.constant dense<0xFF800000> : vector<8xf32>
    %76 = vector.multi_reduction <maximumf>, %75, %cst_30 [1] : vector<8x10xf32> to vector<8xf32>
    %77 = vector.shape_cast %76 : vector<8xf32> to vector<8x1xf32>
    %78 = vector.broadcast %77 : vector<8x1xf32> to vector<8x10xf32>
    %79 = arith.subf %75, %78 : vector<8x10xf32>
    %80 = math.exp %79 : vector<8x10xf32>
    %cst_31 = arith.constant dense<0.000000e+00> : vector<8xf32>
    %81 = vector.multi_reduction <add>, %80, %cst_31 [1] : vector<8x10xf32> to vector<8xf32>
    %82 = vector.shape_cast %81 : vector<8xf32> to vector<8x1xf32>
    %83 = vector.broadcast %82 : vector<8x1xf32> to vector<8x10xf32>
    %84 = arith.divf %80, %83 : vector<8x10xf32>
    %c0_32 = arith.constant 0 : index
    %c0_33 = arith.constant 0 : index
    %85 = vector.load %arg7[%c0_32, %c0_33] : memref<8x10xf32, #tpu.memory_space<vmem>>, vector<8x10xf32>
    tpu.vector_store %arg7[%c0_32, %c0_33], %84 {strides = array<i32>} : memref<8x10xf32, #tpu.memory_space<vmem>>, vector<8x10xf32>,
    return
  }
}

</mosaic_0001>

<bundles_post_ra>
// kernel: tile.13
= control target key start
LH: loop header
LB: loop body
LE: loop exit
PB: predicated region body
PF: predicated region fallthrough
CT: control target
= control target key end

     0   :  { %s28_s0 = inlined_call_operand.vmem [shape: f32[8], index: 0, kind: input, shape index: {}]   ;;  %s29_s1 = inlined_call_operand.vmem [shape: f32[16,8], index: 1, kind: output, shape index: {}]  }
   0x1   :  { %v4_v0 = vld [vmem:[%s28_s0] ss:$0 sm:$0xff] }
   0x2   :  { %5 = vst [vmem:[%s29_s1] sm:$0xff] %v4_v0 }
   0x3   :  { %8 = vst [vmem:[%s29_s1 + $0x8] sm:$0xff] %v4_v0 }

// kernel: tile.18
= control target key start
LH: loop header
LB: loop body
LE: loop exit
PB: predicated region body
PF: predicated region fallthrough
CT: control target
= control target key end

     0   :  { %s22_s0 = inlined_call_operand.vmem [shape: f32[16], index: 0, kind: input, shape index: {}]   ;;  %s23_s1 = inlined_call_operand.vmem [shape: f32[8,16], index: 1, kind: output, shape index: {}]  }
   0x1   :  { %v4_v0 = vld [vmem:[%s22_s0] ss:$0 sm:$0xff] }
   0x2   :  { %5 = vst [vmem:[%s23_s1] sm:$0xff] %v4_v0 }

// kernel: vggnet_forward.1
= control target key start
LH: loop header
LB: loop body
LE: loop exit
PB: predicated region body
PF: predicated region fallthrough
CT: control target
= control target key end

     0   :  { %s3321_s0 = inlined_call_operand.vmem [shape: bf16[128,192], index: 0, kind: input, shape index: {}]   ;;  %s3322_s1 = inlined_call_operand.vmem [shape: bf16[192,128], index: 1, kind: input, shape index: {}]   ;;  %s3323_s2 = inlined_call_operand.vmem [shape: bf16[384,128], index: 2, kind: input, shape index: {}]   ;;  %s3324_s3 = inlined_call_operand.vmem [shape: bf16[512,64], index: 3, kind: input, shape index: {}]   ;;  %s3325_s4 = inlined_call_operand.vmem [shape: bf16[64,64], index: 4, kind: input, shape index: {}]   ;;  %s3326_s5 = inlined_call_operand.vmem [shape: bf16[64,10], index: 5, kind: input, shape index: {}]   ;;  %s3327_s6 = inlined_call_operand.vmem [shape: f32[8,128], index: 6, kind: input, shape index: {}]   ;;  %s3328_s7 = inlined_call_operand.hbm [shape: f32[8,10], index: 7, kind: output, shape index: {}]  }
   0x1   :  { %v2222_v0 = vld [vmem:[%s3322_s1 + $0x38] sm:$0xff]  ;;  %v2221_v2 = vld [vmem:[%s3322_s1 + $0x30] sm:$0xff]  ;;  %v2220_v4 = vld [vmem:[%s3322_s1 + $0x28] sm:$0xff] }
   0x2   :  { %v2226_v1 = vld [vmem:[%s3322_s1 + $0x58] sm:$0xff]  ;;  %239 = vmatpush.bf16.msra.mxu0 %v2222_v0  ;;  %v2225_v3 = vld [vmem:[%s3322_s1 + $0x50] sm:$0xff] }
   0x3   :  { %292 = vmatpush.bf16.msra.mxu1 %v2226_v1 }
   0x6   :  { %240 = vmatpush.bf16.msra.mxu0 %v2221_v2 }
   0x7   :  { %12 = vsyncpa [#allocation3], 0  ;;  %293 = vmatpush.bf16.msra.mxu1 %v2225_v3  ;;  %v2224_v5 = vld [vmem:[%s3322_s1 + $0x48] sm:$0xff]  ;;  %v2219_v6 = vld [vmem:[%s3322_s1 + $0x20] sm:$0xff]  ;;  %vm214_vm0 = vcmask 523264   ;;  %vm2373_vm5 = vmmov 1  }
   0x8   :  { %v2223_v7 = vld [vmem:[%s3322_s1 + $0x40] sm:$0xff]  ;;  %v1769_v9 = vld [vmem:[%s3321_s0 + $0x8] sm:$0xf0]  ;;  %v2218_v10 = vld [vmem:[%s3322_s1 + $0x18] sm:$0xff]  ;;  %s1756_s22 = sshll.u32 %s3328_s7, 4  ;;  %s1757_s22 = int_to_ptr.hbm [resolvable:$true] %s1756_s22 }
   0x9   :  { %v2199_v8 = vld [vmem:[%s3321_s0 + $0x4] sm:$0xf]  ;;  %v2217_v12 = vld [vmem:[%s3322_s1 + $0x10] sm:$0xff]  ;;  %v2216_v13 = vld [vmem:[%s3322_s1 + $0x8] sm:$0xff] }
   0xa   :  { %241 = vmatpush.bf16.msra.mxu0 %v2220_v4  ;;  %v1772_v11 = vor.u32 %v2199_v8, %v1769_v9  ;;  %v2215_v14 = vld [vmem:[%s3322_s1] sm:$0xff]  ;;  %v2200_v16 = vld [vmem:[%s3321_s0 + $0x4] sm:$0xf0]  ;;  %v2201_v17 = vld [vmem:[%s3321_s0 + $0x14] sm:$0xf] }
   0xb   :  { %294 = vmatpush.bf16.msra.mxu1 %v2224_v5  ;;  %v1767_v15 = vld [vmem:[%s3321_s0] sm:$0xf]  ;;  %v1777_v18 = vld [vmem:[%s3321_s0 + $0x18] sm:$0xf0]  ;;  %v1775_v21 = vld [vmem:[%s3321_s0 + $0x10] sm:$0xf] }
   0xc   :  { %v1768_v19 = vor.u32 %v2200_v16, %v1767_v15  ;;  %v1780_v20 = vor.u32 %v2201_v17, %v1777_v18  ;;  %v2202_v22 = vld [vmem:[%s3321_s0 + $0x14] sm:$0xf0]  ;;  %v2203_v23 = vld [vmem:[%s3321_s0 + $0x24] sm:$0xf]  ;;  %v1785_v24 = vld [vmem:[%s3321_s0 + $0x28] sm:$0xf0] }
   0xd   :  { %v1776_v25 = vor.u32 %v2202_v22, %v1775_v21  ;;  %v1788_v26 = vor.u32 %v2203_v23, %v1785_v24  ;;  %v1783_v27 = vld [vmem:[%s3321_s0 + $0x20] sm:$0xf]  ;;  %v2204_v28 = vld [vmem:[%s3321_s0 + $0x24] sm:$0xf0]  ;;  %v2205_v29 = vld [vmem:[%s3321_s0 + $0x34] sm:$0xf] }
   0xe   :  { %242 = vmatpush.bf16.msra.mxu0 %v2219_v6  ;;  %v1793_v30 = vld [vmem:[%s3321_s0 + $0x38] sm:$0xf0]  ;;  %v1784_v31 = vor.u32 %v2204_v28, %v1783_v27  ;;  %v1791_v33 = vld [vmem:[%s3321_s0 + $0x30] sm:$0xf]  ;;  %v2206_v34 = vld [vmem:[%s3321_s0 + $0x34] sm:$0xf0] }
   0xf   :  { %295 = vmatpush.bf16.msra.mxu1 %v2223_v7  ;;  %v1796_v32 = vor.u32 %v2205_v29, %v1793_v30  ;;  %v2207_v35 = vld [vmem:[%s3321_s0 + $0x44] sm:$0xf]  ;;  %v1801_v36 = vld [vmem:[%s3321_s0 + $0x48] sm:$0xf0]  ;;  %v1792_v37 = vor.u32 %v2206_v34, %v1791_v33  ;;  %v1799_v39 = vld [vmem:[%s3321_s0 + $0x40] sm:$0xf]  ;;  %v369_v7 = vlaneseq }
  0x10   :  { %v1804_v38 = vor.u32 %v2207_v35, %v1801_v36  ;;  %v2208_v40 = vld [vmem:[%s3321_s0 + $0x44] sm:$0xf0]  ;;  %v2209_v41 = vld [vmem:[%s3321_s0 + $0x54] sm:$0xf]  ;;  %v1809_v42 = vld [vmem:[%s3321_s0 + $0x58] sm:$0xf0] }
  0x11   :  { %v1800_v43 = vor.u32 %v2208_v40, %v1799_v39  ;;  %v1812_v44 = vor.u32 %v2209_v41, %v1809_v42  ;;  %v1807_v45 = vld [vmem:[%s3321_s0 + $0x50] sm:$0xf]  ;;  %v2210_v46 = vld [vmem:[%s3321_s0 + $0x54] sm:$0xf0]  ;;  %v2211_v47 = vld [vmem:[%s3321_s0 + $0x64] sm:$0xf] }
  0x12   :  { %243 = vmatpush.bf16.msra.mxu0 %v2218_v10  ;;  %1877 = vmatmul.msk.bf16.vlgmr.msra.gmra.mxu1 %vm214_vm0, %v1772_v11  ;;  %v1817_v48 = vld [vmem:[%s3321_s0 + $0x68] sm:$0xf0]  ;;  %v1808_v49 = vor.u32 %v2210_v46, %v1807_v45  ;;  %v1815_v51 = vld [vmem:[%s3321_s0 + $0x60] sm:$0xf]  ;;  %v2212_v52 = vld [vmem:[%s3321_s0 + $0x64] sm:$0xf0] }
  0x13   :  { %v1820_v50 = vor.u32 %v2211_v47, %v1817_v48  ;;  %v2213_v53 = vld [vmem:[%s3321_s0 + $0x74] sm:$0xf]  ;;  %v1825_v54 = vld [vmem:[%s3321_s0 + $0x78] sm:$0xf0]  ;;  %v1816_v55 = vor.u32 %v2212_v52, %v1815_v51  ;;  %v1823_v57 = vld [vmem:[%s3321_s0 + $0x70] sm:$0xf] }
  0x14   :  { %v1828_v56 = vor.u32 %v2213_v53, %v1825_v54  ;;  %v2214_v58 = vld [vmem:[%s3321_s0 + $0x74] sm:$0xf0]  ;;  %v2560_v0 = vld [vmem:[%s3327_s6] sm:$0xff]  ;;  %v2568_v11 = vshrl.u32 %v369_v7, 7  ;;  %s2372_s0 = smov 120  }
  0x15   :  { %v1824_v59 = vor.u32 %v2214_v58, %v1823_v57  ;;  %v2563_v1 = vperm.slane %v2560_v0, 0 }
  0x16   :  { %244 = vmatpush.bf16.msra.mxu0 %v2217_v12  ;;  %vm371_vm1 = vcmp.lt.s32.totalorder %v2568_v11, 7  ;;  %vm611_vm2 = vcmp.lt.s32.totalorder %v2568_v11, 2  ;;  %vm676_vm3 = vcmp.lt.s32.totalorder %v2568_v11, 6 }
  0x1a   :  { %245 = vmatpush.bf16.msra.mxu0 %v2216_v13 }
  0x1e   :  { %246 = vmatpush.bf16.msra.mxu0 %v2215_v14 }
  0x21   :  { %247 = vmatmul.bf16.vlgmr.msra.gmra.mxu0 %v1768_v19 }
  0x22   :  { %1878 = vmatmul.msk.bf16.gmra.mxu1 %vm214_vm0, %v1780_v20 }
  0x31   :  { %252 = vmatmul.bf16.gmra.mxu0 %v1776_v25 }
  0x32   :  { %1879 = vmatmul.msk.bf16.gmra.mxu1 %vm214_vm0, %v1788_v26 }
  0x41   :  { %257 = vmatmul.bf16.gmra.mxu0 %v1784_v31 }
  0x42   :  { %1880 = vmatmul.msk.bf16.gmra.mxu1 %vm214_vm0, %v1796_v32 }
  0x51   :  { %262 = vmatmul.bf16.gmra.mxu0 %v1792_v37 }
  0x52   :  { %1881 = vmatmul.msk.bf16.gmra.mxu1 %vm214_vm0, %v1804_v38 }
  0x61   :  { %267 = vmatmul.bf16.gmra.mxu0 %v1800_v43 }
  0x62   :  { %1882 = vmatmul.msk.bf16.gmra.mxu1 %vm214_vm0, %v1812_v44 }
  0x71   :  { %272 = vmatmul.bf16.gmra.mxu0 %v1808_v49 }
  0x72   :  { %1883 = vmatmul.msk.bf16.gmra.mxu1 %vm214_vm0, %v1820_v50 }
  0x81   :  { %277 = vmatmul.bf16.gmra.mxu0 %v1816_v55 }
  0x82   :  { %1884 = vmatmul.msk.bf16.gmra.mxu1 %vm214_vm0, %v1828_v56 }
  0x8f   :  { %v297_v60 = vpop.f32.mrf.mxu1 }
  0x91   :  { %282 = vmatmul.bf16.gmra.mxu0 %v1824_v59 }
  0x97   :  { %v299_v61 = vpop.f32.mrf.mxu1 }
  0x9e   :  { %v248_v62 = vpop.f32.mrf.mxu0 }
  0x9f   :  { %v302_v63 = vpop.f32.mrf.mxu1  ;;  %v249_v3 = vadd.f32 %v248_v62, %v2563_v1 }
  0xa1   :  { %v298_v8 = vadd.f32 %v297_v60, %v249_v3 }
  0xa3   :  { %v337_v12 = vmax.f32 %v298_v8, 0.0 }
  0xa5   :  { %v2572_v17 = vrot.slane %v337_v12, 1 }
  0xa6   :  { %v250_v2 = vpop.f32.mrf.mxu0 }
  0xa7   :  { %v251_v4 = vadd.f32 %v250_v2, %v2563_v1  ;;  %v304_v5 = vpop.f32.mrf.mxu1 }
  0xa9   :  { %v300_v6 = vadd.f32 %v299_v61, %v251_v4 }
  0xab   :  { %v338_v9 = vmax.f32 %v300_v6, 0.0 }
  0xad   :  { %v354_v15 = vrot.slane %v338_v9, 1 }
  0xae   :  { %v253_v10 = vpop.f32.mrf.mxu0 }
  0xaf   :  { %v254_v13 = vadd.f32 %v253_v10, %v2563_v1  ;;  %v307_v14 = vpop.f32.mrf.mxu1  ;;  %v386_v20 = vsel %vm371_vm1, %v2572_v17, %v354_v15 }
  0xb0   :  { %v2580_v25 = vmax.f32 %v337_v12, %v386_v20 }
  0xb1   :  { %v303_v16 = vadd.f32 %v302_v63, %v254_v13 }
  0xb3   :  { %v339_v18 = vmax.f32 %v303_v16, 0.0 }
  0xb5   :  { %v355_v19 = vrot.slane %v339_v18, 1 }
  0xb6   :  { %v255_v21 = vpop.f32.mrf.mxu0 }
  0xb7   :  { %v256_v22 = vadd.f32 %v255_v21, %v2563_v1  ;;  %v385_v23 = vsel %vm371_vm1, %v354_v15, %v355_v19  ;;  %v309_v24 = vpop.f32.mrf.mxu1 }
  0xb8   :  { %v2582_v26 = vmax.f32 %v338_v9, %v385_v23 }
  0xb9   :  { %v305_v27 = vadd.f32 %v304_v5, %v256_v22 }
  0xba   :  { %v2296_v28 = vpack.i.bf16 %v2582_v26, %v2580_v25 }
  0xbb   :  { %v340_v29 = vmax.f32 %v305_v27, 0.0 }
  0xbc   :  { %2297 = vrot.lane.b32.xlu0 %v2296_v28, %s2372_s0  ;;  %v2242_v28 = vld [vmem:[%s3323_s2 + $0x78] sm:$0xff] }
  0xbd   :  { %v356_v30 = vrot.slane %v340_v29, 1  ;;  %975 = vmatpush.bf16.msra.mxu3 %v2242_v28 }
  0xbe   :  { %v258_v31 = vpop.f32.mrf.mxu0 }
  0xbf   :  { %v259_v32 = vadd.f32 %v258_v31, %v2563_v1  ;;  %v384_v33 = vsel %vm371_vm1, %v355_v19, %v356_v30  ;;  %v312_v34 = vpop.f32.mrf.mxu1 }
  0xc0   :  { %v2590_v35 = vmax.f32 %v339_v18, %v384_v33  ;;  %v2241_v33 = vld [vmem:[%s3323_s2 + $0x70] sm:$0xff] }
  0xc1   :  { %v308_v36 = vadd.f32 %v307_v14, %v259_v32  ;;  %976 = vmatpush.bf16.msra.mxu3 %v2241_v33 }
  0xc2   :  { %408 = vrot.lane.b32.xlu1 %v2590_v35, %s2372_s0 }
  0xc3   :  { %v341_v37 = vmax.f32 %v308_v36, 0.0 }
  0xc5   :  { %v357_v38 = vrot.slane %v341_v37, 1 }
  0xc6   :  { %v260_v39 = vpop.f32.mrf.mxu0 }
  0xc7   :  { %v261_v40 = vadd.f32 %v260_v39, %v2563_v1  ;;  %v383_v41 = vsel %vm371_vm1, %v356_v30, %v357_v38  ;;  %v314_v43 = vpop.f32.mrf.mxu1  ;;  %v2250_v39 = vld [vmem:[%s3323_s2 + $0xb8] sm:$0xff] }
  0xc8   :  { %v2597_v42 = vmax.f32 %v340_v29, %v383_v41  ;;  %1024 = vmatpush.bf16.msrb.mxu1 %v2250_v39  ;;  %v452_v39 = vadd.s32 8, %v2568_v11 }
  0xc9   :  { %v310_v44 = vadd.f32 %v309_v24, %v261_v40  ;;  %v2240_v40 = vld [vmem:[%s3323_s2 + $0x68] sm:$0xff] }
  0xca   :  { %410 = vrot.lane.b32.xlu1 %v2597_v42, %s2372_s0  ;;  %977 = vmatpush.bf16.msra.mxu3 %v2240_v40 }
  0xcb   :  { %v342_v45 = vmax.f32 %v310_v44, 0.0 }
  0xcd   :  { %v358_v46 = vrot.slane %v342_v45, 1 }
  0xce   :  { %v263_v47 = vpop.f32.mrf.mxu0 }
  0xcf   :  { %v264_v48 = vadd.f32 %v263_v47, %v2563_v1  ;;  %v382_v49 = vsel %vm371_vm1, %v357_v38, %v358_v46  ;;  %v317_v52 = vpop.f32.mrf.mxu1 }
  0xd0   :  { %v2604_v50 = vmax.f32 %v341_v37, %v382_v49 }
  0xd1   :  { %v313_v51 = vadd.f32 %v312_v34, %v264_v48 }
  0xd2   :  { %412 = vrot.lane.b32.xlu2 %v2604_v50, %s2372_s0 }
  0xd3   :  { %v343_v53 = vmax.f32 %v313_v51, 0.0  ;;  %v2248_v51 = vld [vmem:[%s3323_s2 + $0xa8] sm:$0xff] }
  0xd5   :  { %v359_v54 = vrot.slane %v343_v53, 1 }
  0xd6   :  { %v265_v55 = vpop.f32.mrf.mxu0 }
  0xd7   :  { %v266_v56 = vadd.f32 %v265_v55, %v2563_v1  ;;  %v381_v57 = vsel %vm371_vm1, %v358_v46, %v359_v54  ;;  %v319_v61 = vpop.f32.mrf.mxu1 }
  0xd8   :  { %v2611_v58 = vmax.f32 %v342_v45, %v381_v57  ;;  %v2239_v45 = vld [vmem:[%s3323_s2 + $0x60] sm:$0xff] }
  0xd9   :  { %v315_v59 = vadd.f32 %v314_v43, %v266_v56  ;;  %v2249_v43 = vld [vmem:[%s3323_s2 + $0xb0] sm:$0xff]  ;;  %978 = vmatpush.bf16.msra.mxu3 %v2239_v45  ;;  %v2247_v56 = vld [vmem:[%s3323_s2 + $0xa0] sm:$0xff]  ;;  %v478_v45 = vand.u32 15, %v452_v39  ;;  %v2228_v39 = vld [vmem:[%s3323_s2 + $0x8] sm:$0xff] }
  0xda   :  { %414 = vrot.lane.b32.xlu2 %v2611_v58, %s2372_s0  ;;  %1025 = vmatpush.bf16.msrb.mxu1 %v2249_v43 }
  0xdb   :  { %v344_v60 = vmax.f32 %v315_v59, 0.0  ;;  %v2237_v59 = vld [vmem:[%s3323_s2 + $0x50] sm:$0xff]  ;;  %vm645_vm4 = vcmp.lt.s32.totalorder %v478_v45, 14  ;;  %v456_v45 = vadd.s32 40, %v2568_v11 }
  0xdc   :  { %vm2005_vm6 = vmpackc.low %vm645_vm4, %vm2373_vm5 }
  0xdd   :  { %v360_v62 = vrot.slane %v344_v60, 1 }
  0xde   :  { %v268_v63 = vpop.f32.mrf.mxu0  ;;  %1026 = vmatpush.bf16.msrb.mxu1 %v2248_v51 }
  0xdf   :  { %v269_v2 = vadd.f32 %v268_v63, %v2563_v1  ;;  %v380_v3 = vsel %vm371_vm1, %v359_v54, %v360_v62  ;;  %v322_v10 = vpop.f32.mrf.mxu1  ;;  %v2246_v63 = vld [vmem:[%s3323_s2 + $0x98] sm:$0xff] }
  0xe0   :  { %v2618_v4 = vmax.f32 %v343_v53, %v380_v3 }
  0xe1   :  { %v318_v5 = vadd.f32 %v317_v52, %v269_v2  ;;  %v2238_v52 = vld [vmem:[%s3323_s2 + $0x58] sm:$0xff]  ;;  %v2236_v2 = vld [vmem:[%s3323_s2 + $0x48] sm:$0xff] }
  0xe2   :  { %979 = vmatpush.bf16.msra.mxu3 %v2238_v52  ;;  %1027 = vmatpush.bf16.msrb.mxu1 %v2247_v56 }
  0xe3   :  { %v345_v6 = vmax.f32 %v318_v5, 0.0 }
  0xe5   :  { %v361_v8 = vrot.slane %v345_v6, 1 }
  0xe6   :  { %v270_v9 = vpop.f32.mrf.mxu0  ;;  %980 = vmatpush.bf16.msra.mxu3 %v2237_v59  ;;  %1028 = vmatpush.bf16.msrb.mxu1 %v2246_v63 }
  0xe7   :  { %v271_v12 = vadd.f32 %v270_v9, %v2563_v1  ;;  %v379_v13 = vsel %vm371_vm1, %v360_v62, %v361_v8  ;;  %v324_v22 = vpop.f32.mrf.mxu1  ;;  %v2245_v9 = vld [vmem:[%s3323_s2 + $0x90] sm:$0xff] }
  0xe8   :  { %v2623_v14 = vmax.f32 %v344_v60, %v379_v13 }
  0xe9   :  { %v320_v15 = vadd.f32 %v319_v61, %v271_v12 }
  0xea   :  { %418 = vrot.lane.b32.xlu1 %v2623_v14, %s2372_s0  ;;  %981 = vmatpush.bf16.msra.mxu3 %v2236_v2 }
  0xeb   :  { %v346_v16 = vmax.f32 %v320_v15, 0.0  ;;  %1029 = vmatpush.bf16.msrb.mxu1 %v2245_v9 }
  0xed   :  { %v362_v18 = vrot.slane %v346_v16, 1 }
  0xee   :  { %v273_v19 = vpop.f32.mrf.mxu0 }
  0xef   :  { %v274_v20 = vadd.f32 %v273_v19, %v2563_v1  ;;  %v378_v21 = vsel %vm371_vm1, %v361_v8, %v362_v18  ;;  %v327_v37 = vpop.f32.mrf.mxu1 }
  0xf0   :  { %v2630_v23 = vmax.f32 %v345_v6, %v378_v21 }
  0xf1   :  { %v323_v24 = vadd.f32 %v322_v10, %v274_v20  ;;  %v2235_v10 = vld [vmem:[%s3323_s2 + $0x40] sm:$0xff] }
  0xf2   :  { %420 = vrot.lane.b32.xlu2 %v2630_v23, %s2372_s0  ;;  %982 = vmatpush.bf16.msra.mxu3 %v2235_v10 }
  0xf3   :  { %v347_v27 = vmax.f32 %v323_v24, 0.0  ;;  %v2243_v24 = vld [vmem:[%s3323_s2 + $0x80] sm:$0xff] }
  0xf5   :  { %v363_v29 = vrot.slane %v347_v27, 1 }
  0xf6   :  { %v275_v30 = vpop.f32.mrf.mxu0 }
  0xf7   :  { %v276_v31 = vadd.f32 %v275_v30, %v2563_v1  ;;  %v377_v32 = vsel %vm371_vm1, %v362_v18, %v363_v29  ;;  %v329_v54 = vpop.f32.mrf.mxu1 }
  0xf8   :  { %v2643_v34 = vmax.f32 %v346_v16, %v377_v32  ;;  %v2244_v16 = vld [vmem:[%s3323_s2 + $0x88] sm:$0xff] }
  0xf9   :  { %v325_v36 = vadd.f32 %v324_v22, %v276_v31  ;;  %1030 = vmatpush.bf16.msrb.mxu1 %v2244_v16 }
  0xfb   :  { %v348_v38 = vmax.f32 %v325_v36, 0.0 }
  0xfd   :  { %v364_v41 = vrot.slane %v348_v38, 1  ;;  %1031 = vmatpush.bf16.msrb.mxu1 %v2243_v24 }
  0xfe   :  { %v278_v44 = vpop.f32.mrf.mxu0 }
  0xff   :  { %v279_v46 = vadd.f32 %v278_v44, %v2563_v1  ;;  %v376_v47 = vsel %vm371_vm1, %v363_v29, %v364_v41  ;;  %v332_v5 = vpop.f32.mrf.mxu1 }
 0x100   :  { %v2660_v48 = vmax.f32 %v347_v27, %v376_v47 }
 0x101   :  { %v2662_v49 = vadd.f32 %v327_v37, %v279_v46 }
 0x102   :  { %424 = vrot.lane.b32.xlu1 %v2660_v48, %s2372_s0 }
 0x103   :  { %v349_v53 = vmax.f32 %v2662_v49, 0.0 }
 0x105   :  { %v2675_v55 = vrot.slane %v349_v53, 1 }
 0x106   :  { %v280_v57 = vpop.f32.mrf.mxu0 }
 0x107   :  { %v375_v60 = vsel %vm371_vm1, %v364_v41, %v2675_v55  ;;  %v281_v62 = vadd.f32 %v280_v57, %v2563_v1  ;;  %v334_v27 = vpop.f32.mrf.mxu1 }
 0x108   :  { %v2686_v61 = vmax.f32 %v348_v38, %v375_v60 }
 0x109   :  { %v330_v3 = vadd.f32 %v329_v54, %v281_v62 }
 0x10a   :  { %426 = vrot.lane.b32.xlu2 %v2686_v61, %s2372_s0 }
 0x10b   :  { %v350_v12 = vmax.f32 %v330_v3, 0.0 }
 0x10d   :  { %v366_v18 = vrot.slane %v350_v12, 1 }
 0x10e   :  { %v283_v6 = vpop.f32.mrf.mxu0 }
 0x10f   :  { %v284_v8 = vadd.f32 %v283_v6, %v2563_v1 }
 0x111   :  { %v333_v13 = vadd.f32 %v332_v5, %v284_v8 }
 0x113   :  { %v351_v15 = vmax.f32 %v333_v13, 0.0 }
 0x115   :  { %v367_v19 = vrot.slane %v351_v15, 1 }
 0x116   :  { %v285_v20 = vpop.f32.mrf.mxu0 }
 0x117   :  { %v286_v21 = vadd.f32 %v285_v20, %v2563_v1  ;;  %v373_v22 = vsel %vm371_vm1, %v366_v18, %v367_v19 }
 0x118   :  { %v2713_v28 = vmax.f32 %v350_v12, %v373_v22  ;;  %v454_v12 = vadd.s32 24, %v2568_v11 }
 0x119   :  { %v335_v29 = vadd.f32 %v334_v27, %v286_v21 }
 0x11a   :  { %430 = vrot.lane.b32.xlu1 %v2713_v28, %s2372_s0 }
 0x11b   :  { %v352_v30 = vmax.f32 %v335_v29, 0.0 }
 0x11d   :  { %v368_v31 = vrot.slane %v352_v30, 1 }
 0x11f   :  { %v372_v1 = vsel %vm371_vm1, %v367_v19, %v368_v31  ;;  %v387_v32 = vsel %vm371_vm1, %v368_v31, %v2572_v17  ;;  %v2233_v31 = vld [vmem:[%s3323_s2 + $0x30] sm:$0xff] }
 0x120   :  { %v2722_v33 = vmax.f32 %v351_v15, %v372_v1  ;;  %v2724_v36 = vmax.f32 %v352_v30, %v387_v32  ;;  %v2234_v30 = vld [vmem:[%s3323_s2 + $0x38] sm:$0xff]  ;;  %v2232_v1 = vld [vmem:[%s3323_s2 + $0x28] sm:$0xff]  ;;  %v2231_v32 = vld [vmem:[%s3323_s2 + $0x20] sm:$0xff] }
 0x121   :  { %926 = vmatpush.bf16.msra.mxu2 %v2234_v30 }
 0x122   :  { %432 = vrot.lane.b32.xlu2 %v2722_v33, %s2372_s0  ;;  %434 = vrot.lane.b32.xlu0 %v2724_v36, %s2372_s0 }
 0x125   :  { %927 = vmatpush.bf16.msra.mxu2 %v2233_v31 }
 0x129   :  { %928 = vmatpush.bf16.msra.mxu2 %v2232_v1 }
 0x12a   :  { %416 = vrot.lane.b32.xlu0 %v2618_v4, %s2372_s0 }
 0x12c   :  { %v413_v37 = vpop.permute.xlu2 %412 }
 0x12d   :  { %v440_v44 = vmax.f32 %v2604_v50, %v413_v37  ;;  %929 = vmatpush.bf16.msra.mxu2 %v2231_v32  ;;  %v2230_v37 = vld [vmem:[%s3323_s2 + $0x18] sm:$0xff]  ;;  %v462_v32 = vadd.s32 88, %v2568_v11 }
 0x12e   :  { %v2298_v38 = vpop.permute.xlu0 %2297 }
 0x12f   :  { %v2300_v40 = vunpack.i.h.bf16 %v2298_v38  ;;  %v2299_v41 = vunpack.i.l.bf16 %v2298_v38  ;;  %v599_v60 = vrot.slane %v440_v44, 6  ;;  %v664_v62 = vrot.slane %v440_v44, 2  ;;  %v2229_v38 = vld [vmem:[%s3323_s2 + $0x10] sm:$0xff] }
 0x131   :  { %v437_v17 = vmax.f32 %v2582_v26, %v2300_v40  ;;  %v2735_v43 = vmax.f32 %v2580_v25, %v2299_v41  ;;  %v374_v25 = vsel %vm371_vm1, %v2675_v55, %v366_v18  ;;  %v492_v18 = vand.u32 15, %v454_v12  ;;  %930 = vmatpush.bf16.msra.mxu2 %v2230_v37  ;;  %v2227_v40 = vld [vmem:[%s3323_s2] sm:$0xff]  ;;  %s2374_s2 = smov 112  }
 0x132   :  { %422 = vrot.lane.b32.xlu0 %v2643_v34, %s2372_s0  ;;  %v471_v41 = vand.u32 15, %v2568_v11 }
 0x133   :  { %v596_v46 = vrot.slane %v437_v17, 6  ;;  %v595_v47 = vrot.slane %v2735_v43, 6  ;;  %v661_v51 = vrot.slane %v437_v17, 2  ;;  %v660_v52 = vrot.slane %v2735_v43, 2 }
 0x134   :  { %v415_v54 = vpop.permute.xlu2 %414  ;;  %v409_v56 = vpop.permute.xlu1 %408  ;;  %v710_v26 = vpack.c.bf16 %v437_v17, %v2735_v43  ;;  %vm647_vm7 = vcmp.lt.s32.totalorder %v492_v18, 14  ;;  %vm579_vm9 = vcmp.ge.s32.totalorder %v471_v41, 2  ;;  %v460_v18 = vadd.s32 72, %v2568_v11 }
 0x135   :  { %v2748_v50 = vmax.f32 %v2611_v58, %v415_v54  ;;  %v438_v57 = vmax.f32 %v2590_v35, %v409_v56  ;;  %v2756_v59 = vsel %vm611_vm2, %v595_v47, %v596_v46  ;;  %v2762_v35 = vmax.f32 %v349_v53, %v374_v25  ;;  %vm2008_vm8 = vmpackc.low %vm647_vm7, %vm2373_vm5  ;;  %931 = vmatpush.bf16.msra.mxu2 %v2229_v38 }
 0x136   :  { %983 = vmatmul.bf16.vlgmr.msra.gmra.mxu3 %v710_v26  ;;  %v691_v3 = vsel %vm676_vm3, %v660_v52, %v661_v51  ;;  %vm1981_vm10 = vmpackc.low %vm2373_vm5, %vm579_vm9  ;;  %v506_v26 = vand.u32 15, %v456_v45 }
 0x137   :  { %v600_v63 = vrot.slane %v2748_v50, 6  ;;  %v665_v55 = vrot.slane %v2748_v50, 2  ;;  %v597_v58 = vrot.slane %v438_v57, 6  ;;  %v662_v2 = vrot.slane %v438_v57, 2 }
 0x138   :  { %v716_v29 = vpack.c.bf16 %v2748_v50, %v440_v44  ;;  %vm649_vm11 = vcmp.lt.s32.totalorder %v506_v26, 14 }
 0x139   :  { %v690_v5 = vsel %vm676_vm3, %v661_v51, %v662_v2  ;;  %v2775_v6 = vsel %vm676_vm3, %v664_v62, %v665_v55  ;;  %v2779_v49 = vsel %vm611_vm2, %v596_v46, %v597_v58  ;;  %v2785_v53 = vsel %vm611_vm2, %v599_v60, %v600_v63  ;;  %932 = vmatpush.bf16.msra.mxu2 %v2228_v39  ;;  %vm2011_vm12 = vmpackc.low %vm649_vm11, %vm2373_vm5 }
 0x13a   :  { %428 = vrot.lane.b32.xlu0 %v2762_v35, %s2372_s0  ;;  %v2006_v8 = vpack.c.bf16 %v690_v5, %v691_v3 }
 0x13c   :  { %v411_v9 = vpop.permute.xlu1 %410  ;;  %2007 = vmatmul.msk.bf16.vlgmr.msrb.gmra.mxu1 %vm2005_vm6, %v2006_v8 }
 0x13d   :  { %v439_v10 = vmax.f32 %v2597_v42, %v411_v9  ;;  %933 = vmatpush.bf16.msra.mxu2 %v2227_v40 }
 0x13f   :  { %v598_v13 = vrot.slane %v439_v10, 6  ;;  %v663_v21 = vrot.slane %v439_v10, 2  ;;  %v713_v42 = vpack.c.bf16 %v439_v10, %v438_v57 }
 0x141   :  { %v2793_v15 = vsel %vm611_vm2, %v597_v58, %v598_v13  ;;  %v2797_v16 = vsel %vm611_vm2, %v598_v13, %v599_v60  ;;  %v688_v22 = vsel %vm676_vm3, %v663_v21, %v664_v62  ;;  %v689_v24 = vsel %vm676_vm3, %v662_v2, %v663_v21 }
 0x142   :  { %v1985_v19 = vpack.c.bf16 %v2793_v15, %v2779_v49  ;;  %v1988_v20 = vpack.c.bf16 %v2785_v53, %v2797_v16  ;;  %v2009_v27 = vpack.c.bf16 %v688_v22, %v689_v24  ;;  %v453_v60 = vadd.s32 16, %v2568_v11 }
 0x146   :  { %988 = vmatmul.bf16.gmra.mxu3 %v713_v42  ;;  %v534_v42 = vand.u32 15, %v460_v18  ;;  %v463_v18 = vadd.s32 96, %v2568_v11 }
 0x148   :  { %vm653_vm7 = vcmp.lt.s32.totalorder %v534_v42, 14 }
 0x14c   :  { %2010 = vmatmul.msk.bf16.gmra.mxu1 %vm2008_vm8, %v2009_v27  ;;  %v421_v2 = vpop.permute.xlu2 %420  ;;  %vm2017_vm8 = vmpackc.low %vm653_vm7, %vm2373_vm5 }
 0x14d   :  { %v2862_v49 = vmax.f32 %v2630_v23, %v421_v2  ;;  %v461_v2 = vadd.s32 80, %v2568_v11 }
 0x14f   :  { %v668_v9 = vrot.slane %v2862_v49, 2 }
 0x156   :  { %993 = vmatmul.bf16.gmra.mxu3 %v716_v29  ;;  %v457_v29 = vadd.s32 48, %v2568_v11 }
 0x15c   :  { %v419_v54 = vpop.permute.xlu1 %418 }
 0x15d   :  { %v2848_v25 = vmax.f32 %v2623_v14, %v419_v54  ;;  %v485_v14 = vand.u32 15, %v453_v60  ;;  %v459_v54 = vadd.s32 64, %v2568_v11 }
 0x15f   :  { %vm581_vm13 = vcmp.ge.s32.totalorder %v485_v14, 2  ;;  %v602_v1 = vrot.slane %v2848_v25, 6 }
 0x160   :  { %vm1984_vm14 = vmpackc.low %vm2373_vm5, %vm581_vm13 }
 0x164   :  { %v427_v21 = vpop.permute.xlu2 %426 }
 0x165   :  { %v2887_v24 = vmax.f32 %v2686_v61, %v427_v21  ;;  %v513_v61 = vand.u32 15, %v457_v29 }
 0x167   :  { %vm585_vm9 = vcmp.ge.s32.totalorder %v513_v61, 2 }
 0x174   :  { %v425_v15 = vpop.permute.xlu1 %424 }
 0x18c   :  { %v431_v40 = vpop.permute.xlu1 %430 }
 0x194   :  { %v435_v17 = vpop.permute.xlu0 %434 }
 0x195   :  { %v2835_v44 = vmax.f32 %v2724_v36, %v435_v17  ;;  %v548_v17 = vand.u32 15, %v462_v32 }
 0x197   :  { %v610_v46 = vrot.slane %v2835_v44, 6  ;;  %vm655_vm11 = vcmp.lt.s32.totalorder %v548_v17, 14 }
 0x199   :  { %v627_v51 = vsel %vm611_vm2, %v610_v46, %v595_v47 }
 0x19a   :  { %v1982_v56 = vpack.c.bf16 %v2756_v59, %v627_v51  ;;  %v671_v51 = vrot.slane %v2887_v24, 2 }
 0x19c   :  { %v417_v36 = vpop.permute.xlu0 %416  ;;  %1983 = vmatmul.msk.bf16.vlgmr.msra.gmra.mxu2 %vm1981_vm10, %v1982_v56  ;;  %vm1990_vm10 = vmpackc.low %vm2373_vm5, %vm585_vm9 }
 0x19d   :  { %v442_v57 = vmax.f32 %v2618_v4, %v417_v36  ;;  %v458_v4 = vadd.s32 56, %v2568_v11  ;;  %v527_v36 = vand.u32 15, %v459_v54 }
 0x19f   :  { %v666_v62 = vrot.slane %v442_v57, 2  ;;  %v719_v58 = vpack.c.bf16 %v2848_v25, %v442_v57  ;;  %v520_v5 = vand.u32 15, %v458_v4  ;;  %v601_v16 = vrot.slane %v442_v57, 6 }
 0x1a0   :  { %vm587_vm13 = vcmp.ge.s32.totalorder %v527_v36, 2  ;;  %v464_v57 = vadd.s32 104, %v2568_v11 }
 0x1a1   :  { %998 = vmatmul.bf16.gmra.mxu3 %v719_v58  ;;  %v686_v47 = vsel %vm676_vm3, %v665_v55, %v666_v62  ;;  %v667_v55 = vrot.slane %v2848_v25, 2  ;;  %vm651_vm15 = vcmp.lt.s32.totalorder %v520_v5, 14  ;;  %v620_v38 = vsel %vm611_vm2, %v601_v16, %v602_v1 }
 0x1a2   :  { %v2012_v59 = vpack.c.bf16 %v686_v47, %v2775_v6  ;;  %v455_v6 = vadd.s32 32, %v2568_v11  ;;  %vm2014_vm1 = vmpackc.low %vm651_vm15, %vm2373_vm5  ;;  %v621_v39 = vsel %vm611_vm2, %v600_v63, %v601_v16  ;;  %v603_v25 = vrot.slane %v2862_v49, 6 }
 0x1a3   :  { %v685_v12 = vsel %vm676_vm3, %v666_v62, %v667_v55  ;;  %v684_v23 = vsel %vm676_vm3, %v667_v55, %v668_v9  ;;  %v1991_v41 = vpack.c.bf16 %v620_v38, %v621_v39  ;;  %v433_v62 = vpop.permute.xlu2 %432 }
 0x1a4   :  { %2013 = vmatmul.msk.bf16.gmra.mxu1 %vm2011_vm12, %v2012_v59  ;;  %v423_v3 = vpop.permute.xlu0 %422  ;;  %v499_v13 = vand.u32 15, %v455_v6  ;;  %vm2020_vm12 = vmpackc.low %vm655_vm11, %vm2373_vm5  ;;  %v619_v58 = vsel %vm611_vm2, %v602_v1, %v603_v25  ;;  %v562_v59 = vand.u32 15, %v464_v57  ;;  %v450_v14 = vmax.f32 %v2722_v33, %v433_v62 }
 0x1a5   :  { %v2865_v8 = vmax.f32 %v2643_v34, %v423_v3  ;;  %v2015_v34 = vpack.c.bf16 %v684_v23, %v685_v12  ;;  %v541_v33 = vand.u32 15, %v461_v2 }
 0x1a6   :  { %vm583_vm4 = vcmp.ge.s32.totalorder %v499_v13, 2  ;;  %vm657_vm15 = vcmp.lt.s32.totalorder %v562_v59, 14  ;;  %v674_v3 = vrot.slane %v450_v14, 2  ;;  %v731_v5 = vpack.c.bf16 %v2835_v44, %v450_v14 }
 0x1a7   :  { %v722_v10 = vpack.c.bf16 %v2865_v8, %v2862_v49  ;;  %vm1987_vm6 = vmpackc.low %vm2373_vm5, %vm583_vm4  ;;  %v669_v22 = vrot.slane %v2865_v8, 2  ;;  %vm589_vm4 = vcmp.ge.s32.totalorder %v541_v33, 2 }
 0x1a9   :  { %v683_v31 = vsel %vm676_vm3, %v668_v9, %v669_v22  ;;  %v466_v9 = vadd.s32 120, %v2568_v11 }
 0x1ab   :  { %v576_v13 = vand.u32 15, %v466_v9 }
 0x1ac   :  { %1986 = vmatmul.msk.bf16.gmra.mxu2 %vm1984_vm14, %v1985_v19  ;;  %v2879_v19 = vmax.f32 %v2660_v48, %v425_v15  ;;  %vm1993_vm14 = vmpackc.low %vm2373_vm5, %vm587_vm13  ;;  %v675_v15 = vrot.slane %v2835_v44, 2  ;;  %vm1723_vm13 = vcmask 80896  }
 0x1ad   :  { %vm659_vm7 = vcmp.lt.s32.totalorder %v576_v13, 14 }
 0x1ae   :  { %v670_v27 = vrot.slane %v2879_v19, 2  ;;  %v725_v48 = vpack.c.bf16 %v2887_v24, %v2879_v19  ;;  %v605_v6 = vrot.slane %v2879_v19, 6  ;;  %v677_v19 = vsel %vm676_vm3, %v674_v3, %v675_v15 }
 0x1af   :  { %v692_v21 = vsel %vm676_vm3, %v675_v15, %v660_v52  ;;  %v465_v52 = vadd.s32 112, %v2568_v11 }
 0x1b0   :  { %v682_v30 = vsel %vm676_vm3, %v669_v22, %v670_v27  ;;  %v681_v56 = vsel %vm676_vm3, %v670_v27, %v671_v51  ;;  %v2027_v42 = vpack.c.bf16 %v692_v21, %v677_v19  ;;  %v555_v22 = vand.u32 15, %v463_v18 }
 0x1b1   :  { %1003 = vmatmul.bf16.gmra.mxu3 %v722_v10  ;;  %v2018_v53 = vpack.c.bf16 %v682_v30, %v683_v31  ;;  %v606_v10 = vrot.slane %v2887_v24, 6  ;;  %v569_v30 = vand.u32 15, %v465_v52 }
 0x1b2   :  { %vm591_vm9 = vcmp.ge.s32.totalorder %v555_v22, 2 }
 0x1b3   :  { %v616_v23 = vsel %vm611_vm2, %v605_v6, %v606_v10  ;;  %vm593_vm11 = vcmp.ge.s32.totalorder %v569_v30, 2 }
 0x1b4   :  { %2016 = vmatmul.msk.bf16.gmra.mxu1 %vm2014_vm1, %v2015_v34  ;;  %vm2023_vm1 = vmpackc.low %vm657_vm15, %vm2373_vm5 }
 0x1b9   :  { %v984_v31 = vpop.f32.mrf.mxu3  ;;  %v1033_v61 = vpop.f32.mrf.mxu1 }
 0x1bc   :  { %1989 = vmatmul.msk.bf16.gmra.mxu2 %vm1987_vm6, %v1988_v20  ;;  %v429_v20 = vpop.permute.xlu0 %428  ;;  %vm1996_vm6 = vmpackc.low %vm2373_vm5, %vm589_vm4 }
 0x1bd   :  { %v2901_v37 = vmax.f32 %v2762_v35, %v429_v20  ;;  %v2913_v35 = vmax.f32 %v2713_v28, %v431_v40  ;;  %v604_v28 = vrot.slane %v2865_v8, 6  ;;  %v2973_v40 = vperm.slane %v2560_v0, 1 }
 0x1bf   :  { %v672_v45 = vrot.slane %v2901_v37, 2  ;;  %v728_v50 = vpack.c.bf16 %v2913_v35, %v2901_v37  ;;  %v618_v60 = vsel %vm611_vm2, %v603_v25, %v604_v28  ;;  %v673_v4 = vrot.slane %v2913_v35, 2 }
 0x1c0   :  { %v1994_v47 = vpack.c.bf16 %v618_v60, %v619_v58  ;;  %v617_v12 = vsel %vm611_vm2, %v604_v28, %v605_v6  ;;  %v607_v24 = vrot.slane %v2901_v37, 6  ;;  %v608_v27 = vrot.slane %v2913_v35, 6 }
 0x1c1   :  { %1008 = vmatmul.bf16.gmra.mxu3 %v725_v48  ;;  %v680_v63 = vsel %vm676_vm3, %v671_v51, %v672_v45  ;;  %v679_v49 = vsel %vm676_vm3, %v672_v45, %v673_v4  ;;  %v678_v8 = vsel %vm676_vm3, %v673_v4, %v674_v3  ;;  %v1997_v34 = vpack.c.bf16 %v616_v23, %v617_v12  ;;  %v986_v32 = vpop.f32.mrf.mxu3  ;;  %v1035_v37 = vpop.f32.mrf.mxu1 }
 0x1c2   :  { %v2021_v26 = vpack.c.bf16 %v680_v63, %v681_v56  ;;  %v2024_v55 = vpack.c.bf16 %v678_v8, %v679_v49  ;;  %v614_v29 = vsel %vm611_vm2, %v607_v24, %v608_v27  ;;  %v615_v48 = vsel %vm611_vm2, %v606_v10, %v607_v24 }
 0x1c3   :  { %v2000_v43 = vpack.c.bf16 %v614_v29, %v615_v48 }
 0x1c4   :  { %2019 = vmatmul.msk.bf16.gmra.mxu1 %vm2017_vm8, %v2018_v53  ;;  %vm2026_vm8 = vmpackc.low %vm659_vm7, %vm2373_vm5  ;;  %v609_v53 = vrot.slane %v450_v14, 6 }
 0x1c6   :  { %v612_v16 = vsel %vm611_vm2, %v609_v53, %v610_v46  ;;  %v613_v20 = vsel %vm611_vm2, %v608_v27, %v609_v53  ;;  %vm1201_vm2 = vcmp.lt.s32.totalorder %v2568_v11, 4 }
 0x1c7   :  { %v2003_v1 = vpack.c.bf16 %v612_v16, %v613_v20 }
 0x1c9   :  { %v989_v38 = vpop.f32.mrf.mxu3  ;;  %v1038_v39 = vpop.f32.mrf.mxu1 }
 0x1cc   :  { %1992 = vmatmul.msk.bf16.gmra.mxu2 %vm1990_vm10, %v1991_v41  ;;  %vm1999_vm10 = vmpackc.low %vm2373_vm5, %vm591_vm9 }
 0x1d1   :  { %1013 = vmatmul.bf16.gmra.mxu3 %v728_v50  ;;  %v991_v17 = vpop.f32.mrf.mxu3  ;;  %v1040_v46 = vpop.f32.mrf.mxu1 }
 0x1d4   :  { %2022 = vmatmul.msk.bf16.gmra.mxu1 %vm2020_vm12, %v2021_v26  ;;  %vm2002_vm12 = vmpackc.low %vm2373_vm5, %vm593_vm11 }
 0x1d9   :  { %v994_v63 = vpop.f32.mrf.mxu3 }
 0x1dc   :  { %1995 = vmatmul.msk.bf16.gmra.mxu2 %vm1993_vm14, %v1994_v47 }
 0x1e1   :  { %1018 = vmatmul.bf16.gmra.mxu3 %v731_v5  ;;  %v996_v14 = vpop.f32.mrf.mxu3 }
 0x1e4   :  { %2025 = vmatmul.msk.bf16.gmra.mxu1 %vm2023_vm1, %v2024_v55 }
 0x1ec   :  { %1998 = vmatmul.msk.bf16.gmra.mxu2 %vm1996_vm6, %v1997_v34 }
 0x1f4   :  { %2028 = vmatmul.msk.bf16.gmra.mxu1 %vm2026_vm8, %v2027_v42 }
 0x1fc   :  { %2001 = vmatmul.msk.bf16.gmra.mxu2 %vm1999_vm10, %v2000_v43 }
 0x20c   :  { %2004 = vmatmul.msk.bf16.gmra.mxu2 %vm2002_vm12, %v2003_v1 }
 0x21f   :  { %v935_v41 = vpop.f32.mrf.mxu2 }
 0x220   :  { %v936_v44 = vadd.f32 %v935_v41, %v2973_v40 }
 0x221   :  { %v1043_v36 = vpop.f32.mrf.mxu1 }
 0x222   :  { %v985_v45 = vadd.f32 %v984_v31, %v936_v44 }
 0x224   :  { %v1034_v35 = vadd.f32 %v1033_v61, %v985_v45  ;;  %v999_v10 = vpop.f32.mrf.mxu3 }
 0x226   :  { %v1073_v56 = vmax.f32 %v1034_v35, 0.0 }
 0x227   :  { %v937_v51 = vpop.f32.mrf.mxu2 }
 0x228   :  { %v938_v54 = vadd.f32 %v937_v51, %v2973_v40  ;;  %v2977_v57 = vrot.slane %v1073_v56, 2 }
 0x229   :  { %v1045_v2 = vpop.f32.mrf.mxu1 }
 0x22a   :  { %v987_v50 = vadd.f32 %v986_v32, %v938_v54 }
 0x22c   :  { %v1036_v26 = vadd.f32 %v1035_v37, %v987_v50  ;;  %v1001_v29 = vpop.f32.mrf.mxu3 }
 0x22e   :  { %v1074_v28 = vmax.f32 %v1036_v26, 0.0 }
 0x22f   :  { %v940_v25 = vpop.f32.mrf.mxu2 }
 0x230   :  { %v1090_v0 = vrot.slane %v1074_v28, 2  ;;  %v941_v60 = vadd.f32 %v940_v25, %v2973_v40 }
 0x231   :  { %v1048_v13 = vpop.f32.mrf.mxu1 }
 0x232   :  { %v990_v62 = vadd.f32 %v989_v38, %v941_v60  ;;  %v1119_v58 = vsel %vm676_vm3, %v2977_v57, %v1090_v0 }
 0x233   :  { %v2983_v47 = vmax.f32 %v1073_v56, %v1119_v58 }
 0x234   :  { %v1039_v59 = vadd.f32 %v1038_v39, %v990_v62  ;;  %v1004_v37 = vpop.f32.mrf.mxu3 }
 0x236   :  { %v1075_v4 = vmax.f32 %v1039_v59, 0.0 }
 0x237   :  { %v942_v3 = vpop.f32.mrf.mxu2 }
 0x238   :  { %v1091_v5 = vrot.slane %v1075_v4, 2  ;;  %v943_v49 = vadd.f32 %v942_v3, %v2973_v40 }
 0x239   :  { %v1050_v52 = vpop.f32.mrf.mxu1 }
 0x23a   :  { %v992_v8 = vadd.f32 %v991_v17, %v943_v49  ;;  %v1118_v55 = vsel %vm676_vm3, %v1090_v0, %v1091_v5 }
 0x23b   :  { %v2988_v33 = vmax.f32 %v1074_v28, %v1118_v55 }
 0x23c   :  { %v1041_v6 = vadd.f32 %v1040_v46, %v992_v8 }
 0x23e   :  { %v1076_v9 = vmax.f32 %v1041_v6, 0.0 }
 0x23f   :  { %v945_v12 = vpop.f32.mrf.mxu2 }
 0x240   :  { %v1092_v23 = vrot.slane %v1076_v9, 2  ;;  %v946_v34 = vadd.f32 %v945_v12, %v2973_v40 }
 0x241   :  { %v1053_v41 = vpop.f32.mrf.mxu1 }
 0x242   :  { %v995_v15 = vadd.f32 %v994_v63, %v946_v34  ;;  %v1117_v18 = vsel %vm676_vm3, %v1091_v5, %v1092_v23  ;;  %v1006_v63 = vpop.f32.mrf.mxu3 }
 0x243   :  { %v2993_v19 = vmax.f32 %v1075_v4, %v1117_v18 }
 0x244   :  { %v1044_v21 = vadd.f32 %v1043_v36, %v995_v15 }
 0x246   :  { %v1077_v42 = vmax.f32 %v1044_v21, 0.0 }
 0x247   :  { %v947_v22 = vpop.f32.mrf.mxu2 }
 0x248   :  { %v1093_v24 = vrot.slane %v1077_v42, 2  ;;  %v948_v27 = vadd.f32 %v947_v22, %v2973_v40 }
 0x249   :  { %v1055_v26 = vpop.f32.mrf.mxu1 }
 0x24a   :  { %v997_v48 = vadd.f32 %v996_v14, %v948_v27  ;;  %v1116_v43 = vsel %vm676_vm3, %v1092_v23, %v1093_v24  ;;  %v1009_v60 = vpop.f32.mrf.mxu3 }
 0x24b   :  { %v2998_v30 = vmax.f32 %v1076_v9, %v1116_v43 }
 0x24c   :  { %v1046_v31 = vadd.f32 %v1045_v2, %v997_v48 }
 0x24e   :  { %v1078_v53 = vmax.f32 %v1046_v31, 0.0 }
 0x24f   :  { %v950_v61 = vpop.f32.mrf.mxu2 }
 0x250   :  { %v1094_v16 = vrot.slane %v1078_v53, 2  ;;  %v951_v20 = vadd.f32 %v950_v61, %v2973_v40 }
 0x251   :  { %v1058_v58 = vpop.f32.mrf.mxu1 }
 0x252   :  { %v1000_v1 = vadd.f32 %v999_v10, %v951_v20  ;;  %v1115_v32 = vsel %vm676_vm3, %v1093_v24, %v1094_v16  ;;  %v1011_v14 = vpop.f32.mrf.mxu3 }
 0x253   :  { %v3003_v38 = vmax.f32 %v1077_v42, %v1115_v32 }
 0x254   :  { %v1049_v39 = vadd.f32 %v1048_v13, %v1000_v1 }
 0x256   :  { %v1079_v44 = vmax.f32 %v1049_v39, 0.0 }
 0x257   :  { %v952_v17 = vpop.f32.mrf.mxu2 }
 0x258   :  { %v1095_v45 = vrot.slane %v1079_v44, 2  ;;  %v953_v46 = vadd.f32 %v952_v17, %v2973_v40 }
 0x259   :  { %v1060_v4 = vpop.f32.mrf.mxu1 }
 0x25a   :  { %v1002_v51 = vadd.f32 %v1001_v29, %v953_v46  ;;  %v1114_v35 = vsel %vm676_vm3, %v1094_v16, %v1095_v45  ;;  %v1014_v3 = vpop.f32.mrf.mxu3 }
 0x25b   :  { %v3008_v54 = vmax.f32 %v1078_v53, %v1114_v35 }
 0x25c   :  { %v3010_v50 = vadd.f32 %v1050_v52, %v1002_v51 }
 0x25e   :  { %v1080_v56 = vmax.f32 %v3010_v50, 0.0 }
 0x25f   :  { %v955_v36 = vpop.f32.mrf.mxu2 }
 0x260   :  { %v3015_v28 = vrot.slane %v1080_v56, 2  ;;  %v956_v22 = vadd.f32 %v955_v36, %v2973_v40 }
 0x261   :  { %v1063_v5 = vpop.f32.mrf.mxu1 }
 0x262   :  { %v1113_v25 = vsel %vm676_vm3, %v1095_v45, %v3015_v28  ;;  %v1016_v12 = vpop.f32.mrf.mxu3  ;;  %v1005_v31 = vadd.f32 %v1004_v37, %v956_v22 }
 0x263   :  { %v3020_v0 = vmax.f32 %v1079_v44, %v1113_v25 }
 0x264   :  { %v1054_v46 = vadd.f32 %v1053_v41, %v1005_v31 }
 0x267   :  { %v957_v62 = vpop.f32.mrf.mxu2 }
 0x268   :  { %v958_v6 = vadd.f32 %v957_v62, %v2973_v40  ;;  %v1081_v62 = vmax.f32 %v1054_v46, 0.0 }
 0x269   :  { %v1065_v13 = vpop.f32.mrf.mxu1 }
 0x26a   :  { %v1007_v34 = vadd.f32 %v1006_v63, %v958_v6  ;;  %v1019_v16 = vpop.f32.mrf.mxu3 }
 0x26c   :  { %v1056_v29 = vadd.f32 %v1055_v26, %v1007_v34 }
 0x26e   :  { %v1082_v20 = vmax.f32 %v1056_v29, 0.0  ;;  %v2336_v29 = vpack.i.bf16 %v2998_v30, %v2993_v19 }
 0x26f   :  { %v960_v59 = vpop.f32.mrf.mxu2 }
 0x270   :  { %v961_v55 = vadd.f32 %v960_v59, %v2973_v40  ;;  %v1098_v36 = vrot.slane %v1082_v20, 2 }
 0x271   :  { %v1068_v45 = vpop.f32.mrf.mxu1 }
 0x272   :  { %v1010_v23 = vadd.f32 %v1009_v60, %v961_v55 }
 0x274   :  { %v1059_v24 = vadd.f32 %v1058_v58, %v1010_v23 }
 0x276   :  { %v1083_v53 = vmax.f32 %v1059_v24, 0.0 }
 0x277   :  { %v962_v2 = vpop.f32.mrf.mxu2 }
 0x278   :  { %v963_v9 = vadd.f32 %v962_v2, %v2973_v40  ;;  %v1099_v51 = vrot.slane %v1083_v53, 2 }
 0x279   :  { %v1070_v6 = vpop.f32.mrf.mxu1 }
 0x27a   :  { %v1012_v18 = vadd.f32 %v1011_v14, %v963_v9  ;;  %v1110_v59 = vsel %vm676_vm3, %v1098_v36, %v1099_v51 }
 0x27c   :  { %v1061_v48 = vadd.f32 %v1060_v4, %v1012_v18 }
 0x27e   :  { %v1084_v32 = vmax.f32 %v1061_v48, 0.0 }
 0x27f   :  { %v965_v49 = vpop.f32.mrf.mxu2 }
 0x280   :  { %v966_v8 = vadd.f32 %v965_v49, %v2973_v40  ;;  %v1100_v37 = vrot.slane %v1084_v32, 2  ;;  %v1097_v49 = vrot.slane %v1081_v62, 2 }
 0x282   :  { %v1015_v10 = vadd.f32 %v1014_v3, %v966_v8  ;;  %v1109_v2 = vsel %vm676_vm3, %v1099_v51, %v1100_v37  ;;  %v1021_v3 = vpop.f32.mrf.mxu3 }
 0x283   :  { %v1131_v9 = vmax.f32 %v1083_v53, %v1109_v2 }
 0x284   :  { %v1064_v21 = vadd.f32 %v1063_v5, %v1015_v10  ;;  %v3038_v5 = vmax.f32 %v1082_v20, %v1110_v59 }
 0x286   :  { %v1085_v43 = vmax.f32 %v1064_v21, 0.0  ;;  %v2321_v34 = vpack.i.bf16 %v2988_v33, %v3038_v5 }
 0x287   :  { %v967_v15 = vpop.f32.mrf.mxu2 }
 0x288   :  { %v968_v42 = vadd.f32 %v967_v15, %v2973_v40  ;;  %v1101_v39 = vrot.slane %v1085_v43, 2 }
 0x28a   :  { %v1017_v27 = vadd.f32 %v1016_v12, %v968_v42  ;;  %v1108_v50 = vsel %vm676_vm3, %v1100_v37, %v1101_v39 }
 0x28c   :  { %v1066_v52 = vadd.f32 %v1065_v13, %v1017_v27  ;;  %v1112_v13 = vsel %vm676_vm3, %v3015_v28, %v1097_v49 }
 0x28d   :  { %v3051_v18 = vmax.f32 %v1080_v56, %v1112_v13  ;;  %v1132_v56 = vmax.f32 %v1084_v32, %v1108_v50 }
 0x28e   :  { %v1086_v61 = vmax.f32 %v1066_v52, 0.0  ;;  %v2331_v52 = vpack.i.bf16 %v3008_v54, %v3003_v38 }
 0x28f   :  { %v970_v1 = vpop.f32.mrf.mxu2  ;;  %v2326_v28 = vpack.i.bf16 %v3051_v18, %v3020_v0 }
 0x290   :  { %v1102_v44 = vrot.slane %v1086_v61, 2  ;;  %v971_v17 = vadd.f32 %v970_v1, %v2973_v40 }
 0x292   :  { %v1020_v35 = vadd.f32 %v1019_v16, %v971_v17  ;;  %v1107_v63 = vsel %vm676_vm3, %v1101_v39, %v1102_v44 }
 0x293   :  { %v1133_v26 = vmax.f32 %v1085_v43, %v1107_v63 }
 0x294   :  { %v1069_v25 = vadd.f32 %v1068_v45, %v1020_v35 }
 0x295   :  { %v2301_v60 = vpack.i.bf16 %v1133_v26, %v2983_v47 }
 0x296   :  { %v1087_v58 = vmax.f32 %v1069_v25, 0.0 }
 0x297   :  { %v972_v14 = vpop.f32.mrf.mxu2  ;;  %2302 = vrot.lane.b32.xlu1 %v2301_v60, %s2374_s2 }
 0x298   :  { %v1103_v41 = vrot.slane %v1087_v58, 2  ;;  %v973_v4 = vadd.f32 %v972_v14, %v2973_v40 }
 0x29a   :  { %v1022_v8 = vadd.f32 %v1021_v3, %v973_v4  ;;  %v1106_v55 = vsel %vm676_vm3, %v1102_v44, %v1103_v41 }
 0x29b   :  { %v1134_v10 = vmax.f32 %v1086_v61, %v1106_v55 }
 0x29c   :  { %v1071_v12 = vadd.f32 %v1070_v6, %v1022_v8 }
 0x29d   :  { %v2306_v23 = vpack.i.bf16 %v1131_v9, %v1134_v10 }
 0x29e   :  { %v1088_v40 = vmax.f32 %v1071_v12, 0.0 }
 0x29f   :  { %2307 = vrot.lane.b32.xlu2 %v2306_v23, %s2374_s2  ;;  %2322 = vrot.lane.b32.xlu1 %v2321_v34, %s2374_s2 }
 0x2a0   :  { %v1104_v15 = vrot.slane %v1088_v40, 2 }
 0x2a2   :  { %v1105_v21 = vsel %vm676_vm3, %v1103_v41, %v1104_v15  ;;  %v1120_v42 = vsel %vm676_vm3, %v1104_v15, %v2977_v57  ;;  %v1111_v57 = vsel %vm676_vm3, %v1097_v49, %v1098_v36 }
 0x2a3   :  { %v1135_v22 = vmax.f32 %v1087_v58, %v1105_v21  ;;  %v1136_v24 = vmax.f32 %v1088_v40, %v1120_v42  ;;  %v1129_v48 = vmax.f32 %v1081_v62, %v1111_v57 }
 0x2a5   :  { %v2311_v27 = vpack.i.bf16 %v1136_v24, %v1135_v22  ;;  %v2316_v43 = vpack.i.bf16 %v1129_v48, %v1132_v56 }
 0x2a7   :  { %2327 = vrot.lane.b32.xlu2 %v2326_v28, %s2374_s2  ;;  %2312 = vrot.lane.b32.xlu0 %v2311_v27, %s2374_s2 }
 0x2a8   :  { %2337 = vrot.lane.b32.xlu1 %v2336_v29, %s2374_s2 }
 0x2af   :  { %2317 = vrot.lane.b32.xlu0 %v2316_v43, %s2374_s2 }
 0x2b7   :  { %2332 = vrot.lane.b32.xlu0 %v2331_v52, %s2374_s2 }
 0x2f9   :  { %v2308_v53 = vpop.permute.xlu2 %2307 }
 0x2fa   :  { %v2309_v16 = vunpack.i.l.bf16 %v2308_v53  ;;  %v2310_v63 = vunpack.i.h.bf16 %v2308_v53 }
 0x2fc   :  { %v1182_v17 = vmax.f32 %v1134_v10, %v2309_v16  ;;  %v1179_v4 = vmax.f32 %v1131_v9, %v2310_v63 }
 0x2fe   :  { %v1198_v41 = vrot.slane %v1182_v17, 4 }
 0x301   :  { %v2328_v58 = vpop.permute.xlu2 %2327 }
 0x302   :  { %v2330_v12 = vunpack.i.h.bf16 %v2328_v58  ;;  %v2329_v23 = vunpack.i.l.bf16 %v2328_v58 }
 0x304   :  { %v1176_v28 = vmax.f32 %v3051_v18, %v2330_v12 }
 0x309   :  { %v2303_v31 = vpop.permute.xlu1 %2302 }
 0x30a   :  { %v2304_v61 = vunpack.i.l.bf16 %v2303_v31  ;;  %v2305_v20 = vunpack.i.h.bf16 %v2303_v31 }
 0x30c   :  { %v3074_v1 = vmax.f32 %v2983_v47, %v2304_v61  ;;  %v1181_v45 = vmax.f32 %v1133_v26, %v2305_v20  ;;  %v1192_v20 = vrot.slane %v1176_v28, 4 }
 0x30e   :  { %v1185_v36 = vrot.slane %v3074_v1, 4  ;;  %v1197_v14 = vrot.slane %v1181_v45, 4  ;;  %v1242_v49 = vpack.c.bf16 %v1182_v17, %v1181_v45 }
 0x310   :  { %v3101_v9 = vsel %vm1201_vm2, %v1197_v14, %v1198_v41 }
 0x311   :  { %v3076_v46 = vpop.permute.xlu1 %2322 }
 0x312   :  { %v2324_v47 = vunpack.i.l.bf16 %v3076_v46 }
 0x314   :  { %v1178_v34 = vmax.f32 %v3038_v5, %v2324_v47  ;;  %v1175_v5 = vmax.f32 %v3020_v0, %v2329_v23 }
 0x316   :  { %v1194_v29 = vrot.slane %v1178_v34, 4  ;;  %v1236_v43 = vpack.c.bf16 %v1179_v4, %v1178_v34  ;;  %v1191_v16 = vrot.slane %v1175_v5, 4 }
 0x319   :  { %v2313_v39 = vpop.permute.xlu0 %2312 }
 0x31a   :  { %v2315_v44 = vunpack.i.h.bf16 %v2313_v39  ;;  %v2314_v32 = vunpack.i.l.bf16 %v2313_v39 }
 0x31c   :  { %v1184_v51 = vmax.f32 %v1136_v24, %v2315_v44  ;;  %v1183_v35 = vmax.f32 %v1135_v22, %v2314_v32  ;;  %v1195_v22 = vrot.slane %v1179_v4, 4 }
 0x31e   :  { %v1246_v37 = vpack.c.bf16 %v1184_v51, %v1183_v35  ;;  %v1248_v25 = vpack.c.bf16 %v3074_v1, %v1184_v51  ;;  %v1199_v60 = vrot.slane %v1183_v35, 4  ;;  %v1200_v62 = vrot.slane %v1184_v51, 4 }
 0x31f   :  { %v1244_v6 = vpack.c.bf16 %v1183_v35, %v1182_v17  ;;  %v3123_v61 = vsel %vm1201_vm2, %v1194_v29, %v1195_v22  ;;  %v1230_v35 = vpack.c.bf16 %v1176_v28, %v1175_v5 }
 0x320   :  { %1256 = vmatpush.bf16.msrb.mxu0 %v1246_v37  ;;  %1282 = vmatpush.bf16.msrb.mxu3 %v1248_v25  ;;  %v3084_v26 = vsel %vm1201_vm2, %v1199_v60, %v1200_v62  ;;  %v3090_v59 = vsel %vm1201_vm2, %v1200_v62, %v1185_v36  ;;  %v3096_v10 = vsel %vm1201_vm2, %v1198_v41, %v1199_v60 }
 0x321   :  { %v2318_v2 = vpop.permute.xlu0 %2317  ;;  %v1247_v3 = vpack.c.bf16 %v3090_v59, %v3084_v26  ;;  %v1243_v15 = vpack.c.bf16 %v3096_v10, %v3101_v9 }
 0x322   :  { %v2320_v8 = vunpack.i.h.bf16 %v2318_v2  ;;  %v2319_v55 = vunpack.i.l.bf16 %v2318_v2  ;;  %v1251_v2 = vand.u32 127, %v369_v7 }
 0x323   :  { %1269 = vmatpush.bf16.msrb.mxu2 %v1247_v3  ;;  %v1252_v3 = vmul.u32 16, %v2568_v11  ;;  %v2266_v11 = vld [vmem:[%s3324_s3 + $0x78] sm:$0xff] }
 0x324   :  { %v1177_v40 = vmax.f32 %v1129_v48, %v2320_v8  ;;  %v1180_v13 = vmax.f32 %v1132_v56, %v2319_v55  ;;  %1257 = vmatpush.bf16.msrb.mxu0 %v1242_v49  ;;  %1283 = vmatpush.bf16.msrb.mxu3 %v1244_v6  ;;  %v2338_v56 = vpop.permute.xlu1 %2337 }
 0x325   :  { %v2340_v39 = vunpack.i.h.bf16 %v2338_v56  ;;  %v2339_v44 = vunpack.i.l.bf16 %v2338_v56  ;;  %vm1253_vm3 = vcmp.eq.s32.totalorder %v1251_v2, %v1252_v3  ;;  %v2253_v56 = vld [vmem:[%s3324_s3 + $0x10] sm:$0xff] }
 0x326   :  { %v1238_v21 = vpack.c.bf16 %v1180_v13, %v1179_v4  ;;  %v1240_v42 = vpack.c.bf16 %v1181_v45, %v1180_v13  ;;  %v1196_v24 = vrot.slane %v1180_v13, 4  ;;  %v1193_v27 = vrot.slane %v1177_v40, 4  ;;  %vm3167_vm5 = vmpackc.low %vm1253_vm3, %vm1253_vm3 }
 0x327   :  { %1270 = vmatpush.bf16.msrb.mxu2 %v1243_v15  ;;  %v1234_v31 = vpack.c.bf16 %v1178_v34, %v1177_v40  ;;  %v2325_v45 = vunpack.i.h.bf16 %v3076_v46  ;;  %v1232_v63 = vpack.c.bf16 %v1177_v40, %v1176_v28  ;;  %v3138_v46 = vsel %vm1201_vm2, %v1191_v16, %v1192_v20  ;;  %v2264_v28 = vld [vmem:[%s3324_s3 + $0x68] sm:$0xff] }
 0x328   :  { %1258 = vmatpush.bf16.msrb.mxu0 %v1238_v21  ;;  %1284 = vmatpush.bf16.msrb.mxu3 %v1240_v42  ;;  %v3109_v50 = vsel %vm1201_vm2, %v1196_v24, %v1197_v14  ;;  %v3113_v57 = vsel %vm1201_vm2, %v1195_v22, %v1196_v24  ;;  %v3119_v53 = vsel %vm1201_vm2, %v1193_v27, %v1194_v29  ;;  %v2258_v42 = vld [vmem:[%s3324_s3 + $0x38] sm:$0xff]  ;;  %v2257_v22 = vld [vmem:[%s3324_s3 + $0x30] sm:$0xff] }
 0x329   :  { %v2333_v48 = vpop.permute.xlu0 %2332  ;;  %v1239_v18 = vpack.c.bf16 %v3109_v50, %v3113_v57  ;;  %v1235_v51 = vpack.c.bf16 %v3123_v61, %v3119_v53  ;;  %v3132_v37 = vsel %vm1201_vm2, %v1192_v20, %v1193_v27  ;;  %v1170_v62 = vmax.f32 %v2988_v33, %v2325_v45  ;;  %v2265_v24 = vld [vmem:[%s3324_s3 + $0x70] sm:$0xff]  ;;  %v2255_v27 = vld [vmem:[%s3324_s3 + $0x20] sm:$0xff]  ;;  %v2262_v20 = vld [vmem:[%s3324_s3 + $0x58] sm:$0xff] }
 0x32a   :  { %v2335_v0 = vunpack.i.h.bf16 %v2333_v48  ;;  %v2334_v52 = vunpack.i.l.bf16 %v2333_v48  ;;  %v1231_v47 = vpack.c.bf16 %v3132_v37, %v3138_v46  ;;  %v1233_v29 = vpack.c.bf16 %v3119_v53, %v3132_v37  ;;  %v2273_v53 = vld [vmem:[%s3324_s3 + $0xb0] sm:$0xff]  ;;  %v2278_v45 = vld [vmem:[%s3324_s3 + $0xd8] sm:$0xff]  ;;  %v2259_v37 = vld [vmem:[%s3324_s3 + $0x40] sm:$0xff] }
 0x32b   :  { %1271 = vmatpush.bf16.msrb.mxu2 %v1239_v18  ;;  %v1186_v49 = vrot.slane %v1170_v62, 4  ;;  %v1218_v34 = vpack.c.bf16 %v1170_v62, %v3074_v1  ;;  %v1245_v1 = vpack.c.bf16 %v3084_v26, %v3096_v10  ;;  %v1241_v26 = vpack.c.bf16 %v3101_v9, %v3109_v50  ;;  %v2256_v10 = vld [vmem:[%s3324_s3 + $0x28] sm:$0xff]  ;;  %v2263_v9 = vld [vmem:[%s3324_s3 + $0x60] sm:$0xff]  ;;  %v2254_v50 = vld [vmem:[%s3324_s3 + $0x18] sm:$0xff] }
 0x32c   :  { %v1174_v32 = vmax.f32 %v3008_v54, %v2335_v0  ;;  %v1173_v17 = vmax.f32 %v3003_v38, %v2334_v52  ;;  %1259 = vmatpush.bf16.msrb.mxu0 %v1234_v31  ;;  %1285 = vmatpush.bf16.msrb.mxu3 %v1236_v43  ;;  %v1172_v54 = vmax.f32 %v2998_v30, %v2340_v39  ;;  %v2252_v18 = vld [vmem:[%s3324_s3 + $0x8] sm:$0xff]  ;;  %v2274_v43 = vld [vmem:[%s3324_s3 + $0xb8] sm:$0xff]  ;;  %v2251_v52 = vld [vmem:[%s3324_s3] sm:$0xff] }
 0x32d   :  { %v1171_v38 = vmax.f32 %v2993_v19, %v2339_v44  ;;  %v1216_v7 = vsel %vm1201_vm2, %v1185_v36, %v1186_v49  ;;  %v2282_v31 = vld [vmem:[%s3324_s3 + $0xf8] sm:$0xff]  ;;  %v2272_v39 = vld [vmem:[%s3324_s3 + $0xa8] sm:$0xff]  ;;  %v2279_v44 = vld [vmem:[%s3324_s3 + $0xe0] sm:$0xff] }
 0x32e   :  { %v1189_v25 = vrot.slane %v1173_v17, 4  ;;  %v1190_v60 = vrot.slane %v1174_v32, 4  ;;  %v1226_v58 = vpack.c.bf16 %v1174_v32, %v1173_v17  ;;  %v1228_v14 = vpack.c.bf16 %v1175_v5, %v1174_v32  ;;  %v2261_v32 = vld [vmem:[%s3324_s3 + $0x50] sm:$0xff] }
 0x32f   :  { %1272 = vmatpush.bf16.msrb.mxu2 %v1235_v51  ;;  %v1187_v30 = vrot.slane %v1171_v38, 4  ;;  %v1188_v4 = vrot.slane %v1172_v54, 4  ;;  %v1222_v8 = vpack.c.bf16 %v1172_v54, %v1171_v38  ;;  %v1224_v55 = vpack.c.bf16 %v1173_v17, %v1172_v54  ;;  %v2271_v17 = vld [vmem:[%s3324_s3 + $0xa0] sm:$0xff]  ;;  %v2260_v51 = vld [vmem:[%s3324_s3 + $0x48] sm:$0xff] }
 0x330   :  { %1260 = vmatpush.bf16.msrb.mxu0 %v1230_v35  ;;  %1286 = vmatpush.bf16.msrb.mxu3 %v1232_v63  ;;  %v3145_v41 = vsel %vm1201_vm2, %v1190_v60, %v1191_v16  ;;  %v3149_v19 = vsel %vm1201_vm2, %v1189_v25, %v1190_v60  ;;  %v1220_v40 = vpack.c.bf16 %v1171_v38, %v1170_v62  ;;  %v2280_v16 = vld [vmem:[%s3324_s3 + $0xe8] sm:$0xff]  ;;  %v2270_v35 = vld [vmem:[%s3324_s3 + $0x98] sm:$0xff]  ;;  %v2277_v63 = vld [vmem:[%s3324_s3 + $0xd0] sm:$0xff] }
 0x331   :  { %v1227_v33 = vpack.c.bf16 %v3145_v41, %v3149_v19  ;;  %v1213_v6 = vsel %vm1201_vm2, %v1188_v4, %v1189_v25  ;;  %v1214_v12 = vsel %vm1201_vm2, %v1187_v30, %v1188_v4  ;;  %v1215_v13 = vsel %vm1201_vm2, %v1186_v49, %v1187_v30  ;;  %v2269_v25 = vld [vmem:[%s3324_s3 + $0x90] sm:$0xff]  ;;  %v2276_v60 = vld [vmem:[%s3324_s3 + $0xc8] sm:$0xff]  ;;  %v2267_v38 = vld [vmem:[%s3324_s3 + $0x80] sm:$0xff] }
 0x332   :  { %v1223_v23 = vpack.c.bf16 %v1213_v6, %v1214_v12  ;;  %v1249_v15 = vpack.c.bf16 %v1216_v7, %v3090_v59  ;;  %v1219_v36 = vpack.c.bf16 %v1215_v13, %v1216_v7  ;;  %v2375_v59 = vmov 1.0|1.0   ;;  %v2268_v54 = vld [vmem:[%s3324_s3 + $0x88] sm:$0xff]  ;;  %v2283_v7 = vld [vmem:[%s3325_s4] sm:$0xff] }
 0x333   :  { %1273 = vmatpush.bf16.msrb.mxu2 %v1231_v47  ;;  %v1237_v5 = vpack.c.bf16 %v3113_v57, %v3123_v61  ;;  %v1229_v57 = vpack.c.bf16 %v3138_v46, %v3145_v41  ;;  %v1225_v48 = vpack.c.bf16 %v3149_v19, %v1213_v6  ;;  %v1221_v0 = vpack.c.bf16 %v1214_v12, %v1215_v13  ;;  %v2281_v61 = vld [vmem:[%s3324_s3 + $0xf0] sm:$0xff]  ;;  %v2275_v46 = vld [vmem:[%s3324_s3 + $0xc0] sm:$0xff]  ;;  %v2284_v6 = vld [vmem:[%s3325_s4 + $0x8] sm:$0xff] }
 0x334   :  { %1261 = vmatpush.bf16.msrb.mxu0 %v1226_v58  ;;  %1287 = vmatpush.bf16.msrb.mxu3 %v1228_v14 }
 0x337   :  { %1274 = vmatpush.bf16.msrb.mxu2 %v1227_v33 }
 0x338   :  { %1262 = vmatpush.bf16.msrb.mxu0 %v1222_v8  ;;  %1288 = vmatpush.bf16.msrb.mxu3 %v1224_v55  ;;  %v2286_v8 = vld [vmem:[%s3325_s4 + $0x18] sm:$0xff]  ;;  %v2285_v55 = vld [vmem:[%s3325_s4 + $0x10] sm:$0xff] }
 0x33b   :  { %1275 = vmatpush.bf16.msrb.mxu2 %v1223_v23 }
 0x33c   :  { %1263 = vmatpush.bf16.msrb.mxu0 %v1218_v34  ;;  %1289 = vmatpush.bf16.msrb.mxu3 %v1220_v40  ;;  %v2290_v34 = vld [vmem:[%s3326_s5 + $0x18] sm:$0xff]  ;;  %v2289_v40 = vld [vmem:[%s3326_s5 + $0x10] sm:$0xff] }
 0x33f   :  { %1276 = vmatpush.bf16.msrb.mxu2 %v1219_v36  ;;  %2030 = vmatmul.msk.bf16.vlgmr.msrb.gmra.mxu0 %vm3167_vm5, %v2375_v59 }
 0x340   :  { %1295 = vmatpush.bf16.msra.mxu0 %v1249_v15  ;;  %2034 = vmatmul.msk.bf16.vlgmr.msrb.gmra.mxu3 %vm3167_vm5, %v2375_v59 }
 0x341   :  { %1582 = vmatpush.bf16.msra.mxu3 %v2266_v11 }
 0x342   :  { %2032 = vmatmul.msk.bf16.vlgmr.msrb.gmra.mxu2 %vm3167_vm5, %v2375_v59 }
 0x343   :  { %1569 = vmatpush.bf16.msra.mxu2 %v2258_v42  ;;  %v2345_v42 = vld [vmem:[%s3327_s6] sm:$0xff] }
 0x344   :  { %1296 = vmatpush.bf16.msra.mxu0 %v1245_v1  ;;  %v1376_v36 = vperm.slane %v2345_v42, 2 }
 0x345   :  { %1583 = vmatpush.bf16.msra.mxu3 %v2265_v24 }
 0x347   :  { %1570 = vmatpush.bf16.msra.mxu2 %v2257_v22 }
 0x348   :  { %1297 = vmatpush.bf16.msra.mxu0 %v1241_v26 }
 0x349   :  { %1584 = vmatpush.bf16.msra.mxu3 %v2264_v28 }
 0x34b   :  { %1571 = vmatpush.bf16.msra.mxu2 %v2256_v10 }
 0x34c   :  { %1298 = vmatpush.bf16.msra.mxu0 %v1237_v5 }
 0x34d   :  { %1585 = vmatpush.bf16.msra.mxu3 %v2263_v9  ;;  %v2287_v9 = vld [vmem:[%s3326_s5] sm:$0xff] }
 0x34f   :  { %1572 = vmatpush.bf16.msra.mxu2 %v2255_v27  ;;  %v2288_v27 = vld [vmem:[%s3326_s5 + $0x8] sm:$0xff]  ;;  %s2376_s5 = smov [#allocation2]  }
 0x350   :  { %1299 = vmatpush.bf16.msra.mxu0 %v1233_v29  ;;  %v1631_v29 = vperm.slane %v2345_v42, 3  ;;  %s1754_s6 = sshll.u32 %s2376_s5, 4  ;;  %s1755_s6 = int_to_ptr.vmem [resolvable:$true] %s1754_s6 }
 0x351   :  { %1586 = vmatpush.bf16.msra.mxu3 %v2262_v20 }
 0x353   :  { %1573 = vmatpush.bf16.msra.mxu2 %v2254_v50 }
 0x354   :  { %1300 = vmatpush.bf16.msra.mxu0 %v1229_v57 }
 0x355   :  { %1587 = vmatpush.bf16.msra.mxu3 %v2261_v32 }
 0x357   :  { %1574 = vmatpush.bf16.msra.mxu2 %v2253_v56 }
 0x358   :  { %1301 = vmatpush.bf16.msra.mxu0 %v1225_v48 }
 0x359   :  { %1588 = vmatpush.bf16.msra.mxu3 %v2260_v51 }
 0x35b   :  { %1575 = vmatpush.bf16.msra.mxu2 %v2252_v18 }
 0x35c   :  { %1302 = vmatpush.bf16.msra.mxu0 %v1221_v0 }
 0x35d   :  { %1589 = vmatpush.bf16.msra.mxu3 %v2259_v37 }
 0x35f   :  { %2036 = vmatmul.msk.bf16.vlgmr.msra.gmra.mxu0 %vm3167_vm5, %v2375_v59  ;;  %1576 = vmatpush.bf16.msra.mxu2 %v2251_v52 }
 0x360   :  { %1595 = vmatpush.bf16.msrb.mxu0 %v2274_v43  ;;  %v1682_v43 = vperm.slane %v2345_v42, 4 }
 0x361   :  { %1663 = vmatpush.bf16.msrb.mxu3 %v2286_v8 }
 0x363   :  { %1608 = vmatpush.bf16.msrb.mxu2 %v2282_v31 }
 0x364   :  { %1596 = vmatpush.bf16.msrb.mxu0 %v2273_v53 }
 0x365   :  { %1664 = vmatpush.bf16.msrb.mxu3 %v2285_v55 }
 0x367   :  { %1609 = vmatpush.bf16.msrb.mxu2 %v2281_v61 }
 0x368   :  { %1597 = vmatpush.bf16.msrb.mxu0 %v2272_v39 }
 0x369   :  { %1665 = vmatpush.bf16.msrb.mxu3 %v2284_v6 }
 0x36b   :  { %1610 = vmatpush.bf16.msrb.mxu2 %v2280_v16 }
 0x36c   :  { %1598 = vmatpush.bf16.msrb.mxu0 %v2271_v17 }
 0x36d   :  { %1666 = vmatpush.bf16.msrb.mxu3 %v2283_v7 }
 0x36f   :  { %1611 = vmatpush.bf16.msrb.mxu2 %v2279_v44 }
 0x370   :  { %1599 = vmatpush.bf16.msrb.mxu0 %v2270_v35 }
 0x373   :  { %1612 = vmatpush.bf16.msrb.mxu2 %v2278_v45 }
 0x374   :  { %1600 = vmatpush.bf16.msrb.mxu0 %v2269_v25 }
 0x377   :  { %1613 = vmatpush.bf16.msrb.mxu2 %v2277_v63 }
 0x378   :  { %1601 = vmatpush.bf16.msrb.mxu0 %v2268_v54 }
 0x37b   :  { %1614 = vmatpush.bf16.msrb.mxu2 %v2276_v60 }
 0x37c   :  { %1602 = vmatpush.bf16.msrb.mxu0 %v2267_v38 }
 0x37f   :  { %1615 = vmatpush.bf16.msrb.mxu2 %v2275_v46 }
 0x3bc   :  { %v1265_v62 = vpop.f32.mrf.mxu0 }
 0x3bd   :  { %v1308_v47 = vpack.c.bf16 %v1265_v62, %v1265_v62 }
 0x3bf   :  { %1577 = vmatmul.bf16.vlgmr.msra.gmra.mxu2 %v1308_v47 }
 0x3c3   :  { %v1291_v58 = vpop.f32.mrf.mxu3 }
 0x3c4   :  { %v1267_v14 = vpop.f32.mrf.mxu0  ;;  %v1310_v41 = vpack.c.bf16 %v1291_v58, %v1291_v58 }
 0x3c5   :  { %v1278_v19 = vpop.f32.mrf.mxu2 }
 0x3c6   :  { %v1309_v30 = vpack.c.bf16 %v1278_v19, %v1278_v19  ;;  %1603 = vmatmul.bf16.vlgmr.msrb.gmra.mxu0 %v1310_v41 }
 0x3c8   :  { %1590 = vmatmul.bf16.vlgmr.msra.gmra.mxu3 %v1309_v30 }
 0x3c9   :  { %1714 = vmatpush.bf16.msra.mxu3 %v2290_v34 }
 0x3cb   :  { %v1293_v4 = vpop.f32.mrf.mxu3 }
 0x3cd   :  { %v1280_v33 = vpop.f32.mrf.mxu2  ;;  %1715 = vmatpush.bf16.msra.mxu3 %v2289_v40 }
 0x3d1   :  { %1716 = vmatpush.bf16.msra.mxu3 %v2288_v27 }
 0x3d5   :  { %1717 = vmatpush.bf16.msra.mxu3 %v2287_v9 }
 0x3dc   :  { %v1304_v2 = vpop.f32.mrf.mxu0 }
 0x3dd   :  { %v1311_v3 = vpack.c.bf16 %v1304_v2, %v1304_v2 }
 0x3df   :  { %1616 = vmatmul.bf16.vlgmr.msrb.gmra.mxu2 %v1311_v3 }
 0x3e4   :  { %v1306_v49 = vpop.f32.mrf.mxu0 }
 0x442   :  { %v1578_v12 = vpop.f32.mrf.mxu2 }
 0x443   :  { %v1604_v23 = vpop.f32.mrf.mxu0  ;;  %v1579_v1 = vadd.f32 %v1578_v12, %v1376_v36 }
 0x44a   :  { %v1580_v13 = vpop.f32.mrf.mxu2 }
 0x44b   :  { %v1591_v15 = vpop.f32.mrf.mxu3  ;;  %v1606_v21 = vpop.f32.mrf.mxu0 }
 0x44c   :  { %v1592_v59 = vadd.f32 %v1591_v15, %v1579_v1 }
 0x44e   :  { %v1605_v22 = vadd.f32 %v1604_v23, %v1592_v59 }
 0x453   :  { %v1593_v11 = vpop.f32.mrf.mxu3 }
 0x462   :  { %v1617_v24 = vpop.f32.mrf.mxu2 }
 0x463   :  { %v1618_v26 = vadd.f32 %v1617_v24, %v1605_v22 }
 0x465   :  { %v1621_v10 = vmax.f32 %v1618_v26, 0.0 }
 0x467   :  { %v1622_v28 = vpack.c.bf16 %v1621_v10, %v1621_v10 }
 0x469   :  { %2181 = vmatmul.msk.bf16.vlgmr.msrb.gmra.mxu3 %vm214_vm0, %v1622_v28 }
 0x46a   :  { %v1619_v5 = vpop.f32.mrf.mxu2 }
 0x4ec   :  { %v1668_v50 = vpop.f32.mrf.mxu3 }
 0x4ed   :  { %v1669_v57 = vadd.f32 %v1668_v50, %v1631_v29 }
 0x4ef   :  { %v1672_v56 = vmax.f32 %v1669_v57, 0.0 }
 0x4f1   :  { %v1673_v48 = vpack.c.bf16 %v1672_v56, %v1672_v56 }
 0x4f3   :  { %2198 = vmatmul.msk.bf16.vlgmr.msra.gmra.mxu3 %vm214_vm0, %v1673_v48 }
 0x4f4   :  { %v1670_v18 = vpop.f32.mrf.mxu3 }
 0x576   :  { %v1719_v0 = vpop.f32.mrf.mxu3 }
 0x577   :  { %v1720_v52 = vadd.f32 %v1719_v0, %v1682_v43 }
 0x579   :  { %v1724_v31 = vsel %vm1723_vm13, %v1720_v52, -inf }
 0x57a   :  { %1725 = vmax.xlane.f32.xlu2 %v1724_v31 }
 0x57e   :  { %v1721_v53 = vpop.f32.mrf.mxu3 }
 0x5ed   :  { %v1726_v61 = vpop.xlane.xlu2 %1725 }
 0x5ee   :  { %v1727_v16 = vsub.f32 %v1720_v52, %v1726_v61 }
 0x5f0   :  { %v1728_v20 = vmul.f32 1.442695, %v1727_v16 }
 0x5f2   :  { %2341 = vpow2.f32 %v1728_v20 }
 0x5f8   :  { %v2342_v39 = vpop.eup %2341 }
 0x5f9   :  { %v1730_v44 = vsel %vm1723_vm13, %v2342_v39, 0.0 }
 0x5fa   :  { %1731 = vadd.xlane.f32.xlu0 %v1730_v44 }
 0x66d   :  { %v1732_v32 = vpop.xlane.xlu0 %1731 }
 0x66e   :  { %2343 = vrcp.f32 %v1732_v32  ;;  %v1744_v35 = vand.u32 2147483648, %v1732_v32  ;;  %v1742_v37 = vand.u32 2147483647, %v1732_v32  ;;  %vm1738_vm14 = vweird.f32 %v1732_v32 }
 0x670   :  { %v1745_v60 = vor.u32 1.1754944e-38, %v1744_v35  ;;  %vm1743_vm1 = vcmp.eq.f32.partialorder %v1742_v37, 8.507059e+37 }
 0x674   :  { %v2344_v17 = vpop.eup %2343 }
 0x675   :  { %v1734_v45 = vmul.f32 %v2344_v17, %v1732_v32  ;;  %vm1739_vm0 = vweird.f32 %v2344_v17 }
 0x676   :  { %vm1740_vm15 = vmor %vm1738_vm14, %vm1739_vm0 }
 0x677   :  { %v1735_v51 = vsub.f32 1.0, %v1734_v45 }
 0x679   :  { %v1736_v63 = vmul.f32 %v2344_v17, %v1735_v51 }
 0x67b   :  { %v1737_v25 = vadd.f32 %v2344_v17, %v1736_v63 }
 0x67d   :  { %v1741_v54 = vsel %vm1740_vm15, %v2344_v17, %v1737_v25 }
 0x67e   :  { %v1746_v38 = vsel %vm1743_vm1, %v1745_v60, %v1741_v54 }
 0x67f   :  { %v1747_v46 = vmul.f32 %v2342_v39, %v1746_v38 }
 0x681   :  { %1748 = vst.msk [vmem:[#allocation2] sm:$0xff] %vm1723_vm13, %v1747_v46 }
 0x682   :  { %1759 = dma.vmem_to_hbm [thread:$0]  %s1755_s6, 128, %s1757_s22, [#allocation3]  }
 0x683   :  { %2370 = dma.done.wait [#allocation3], 128  }
 0x684   :  { %2371 = vsyncadd [#allocation3], 4294967168 }
 0x685   :  { %1764 = vsyncpa [#allocation3], 1 }

</bundles_post_ra>
